<compile_context>
chip_gen: v7x
topology: tpu7x:2x2x1
jax: 0.10.0
libtpu: 0.0.40
codegen_flags: <defaults>
</compile_context>

<pallas_src>
import functools
import numpy as np

import jax
import jax.numpy as jnp
from jax.experimental import pallas as pl
from jax.experimental.pallas import tpu as pltpu


# ---------------------------------------------------------------------------
# Fused Pallas kernel: all decoder layers + classifier heads in one pallas_call
# ---------------------------------------------------------------------------
def fused_generator_kernel(x_ref, mask_ref,
                           wqkv_ref, bqkv_ref, wo_ref, bo_ref,
                           g1_ref, be1_ref, w1_ref, b1_ref,
                           w2_ref, b2_ref, g3_ref, be3_ref,
                           wc_ref, bc_ref,
                           out_ref, x_scr,
                           *, num_heads):
    """One grid step == one DecoderLayer (cross_attend=False).

    Activations (B*S, E) live in `x_scr` (VMEM) across grid steps; the
    classifier matmul runs only on the last layer.
    """
    layer = pl.program_id(0)
    n_layers = pl.num_programs(0)

    @pl.when(layer == 0)
    def _():
        x_scr[...] = x_ref[...].astype(jnp.float32)

    x = x_scr[...]                                   # (BS, E), VMEM-resident
    BS, E = x.shape
    Dh = E // num_heads
    scale = 1.0 / float(np.sqrt(Dh))

    # ---- fused Q/K/V projection: one (BS,E)@(E,3E) matmul ----
    qkv = jnp.dot(x, wqkv_ref[...],
                  preferred_element_type=jnp.float32) + bqkv_ref[...]
    q = qkv[:, :E] * scale
    k = qkv[:, E:2 * E]
    v = qkv[:, 2 * E:]

    # additive mask: causal within a batch element, -1e9 across batch elements
    mask_add = mask_ref[...]                         # (BS, BS)

    # ---- multi-head self-attention with output projection folded in ----
    wo = wo_ref[...]                                 # (E, E)
    attn_out = jnp.zeros((BS, E), jnp.float32)
    for h in range(num_heads):                       # static unroll, tiny ops
        lo, hi = h * Dh, (h + 1) * Dh
        qh = q[:, lo:hi]
        kh = k[:, lo:hi]
        vh = v[:, lo:hi]
        s = jnp.dot(qh, kh.T, preferred_element_type=jnp.float32) + mask_add
        s = s - jnp.max(s, axis=-1, keepdims=True)
        p = jnp.exp(s)
        p = p * pl.reciprocal(jnp.sum(p, axis=-1, keepdims=True), approx=True)
        oh = jnp.dot(p, vh, preferred_element_type=jnp.float32)       # (BS, Dh)
        # fold output projection: avoids lane-concat of head outputs
        attn_out = attn_out + jnp.dot(oh, wo[lo:hi, :],
                                      preferred_element_type=jnp.float32)
    attn_out = attn_out + bo_ref[...]

    def layernorm(z, g, b):
        mu = jnp.mean(z, axis=-1, keepdims=True)
        var = jnp.mean(jnp.square(z - mu), axis=-1, keepdims=True)
        return (z - mu) * jax.lax.rsqrt(var + 1e-6) * g + b

    out1 = layernorm(attn_out + x, g1_ref[...], be1_ref[...])

    # ---- feed-forward: Linear -> ReLU -> Linear ----
    hidden = jnp.maximum(
        jnp.dot(out1, w1_ref[...], preferred_element_type=jnp.float32)
        + b1_ref[...], 0.0)
    ffn = jnp.dot(hidden, w2_ref[...],
                  preferred_element_type=jnp.float32) + b2_ref[...]
    out3 = layernorm(ffn + out1, g3_ref[...], be3_ref[...])

    x_scr[...] = out3

    # ---- classifier heads (all positions x all heads, lane-dense) ----
    @pl.when(layer == n_layers - 1)
    def _():
        logits = jnp.dot(out3, wc_ref[...],
                         preferred_element_type=jnp.float32) + bc_ref[...]
        out_ref[...] = logits.astype(out_ref.dtype)


# ---------------------------------------------------------------------------
# pallas_call wrapper
# ---------------------------------------------------------------------------
def run_fused_generator(x_flat, mask_add, packed, wc, bc, *, num_heads):
    BS, E = x_flat.shape
    L = packed['wqkv'].shape[0]
    Hd = packed['w1'].shape[2]
    Npad = wc.shape[1]

    def stacked(shape):
        # per-layer weight: indexed by the layer grid axis, leading dim squeezed
        return pl.BlockSpec((None,) + shape, lambda l, _s=shape: (l,) + (0,) * len(_s))

    def const(shape):
        # layer-invariant tensor: same block every step -> stays VMEM-resident
        return pl.BlockSpec(shape, lambda l, _s=shape: (0,) * len(_s))

    in_specs = [
        const((BS, E)),                               # x
        const((BS, BS)),                              # additive attention mask
        stacked((E, 3 * E)), stacked((1, 3 * E)),     # wqkv, bqkv
        stacked((E, E)), stacked((1, E)),             # wo, bo
        stacked((1, E)), stacked((1, E)),             # layernorm1 gamma/beta
        stacked((E, Hd)), stacked((1, Hd)),           # ffn w1, b1
        stacked((Hd, E)), stacked((1, E)),            # ffn w2, b2
        stacked((1, E)), stacked((1, E)),             # layernorm3 gamma/beta
        const((E, Npad)), const((1, Npad)),           # classifier (all heads)
    ]
    return pl.pallas_call(
        functools.partial(fused_generator_kernel, num_heads=num_heads),
        out_shape=jax.ShapeDtypeStruct((BS, Npad), jnp.float32),
        grid=(L,),
        in_specs=in_specs,
        out_specs=const((BS, Npad)),
        scratch_shapes=[pltpu.VMEM((BS, E), jnp.float32)],
        compiler_params=pltpu.CompilerParams(
            dimension_semantics=("arbitrary",)),      # layers are sequential
    )(x_flat, mask_add,
      packed['wqkv'], packed['bqkv'], packed['wo'], packed['bo'],
      packed['g1'], packed['be1'], packed['w1'], packed['b1'],
      packed['w2'], packed['b2'], packed['g3'], packed['be3'],
      wc, bc)


# ---------------------------------------------------------------------------
# Model glue (embedding, positional encoding, masks, parameter init/packing)
# ---------------------------------------------------------------------------
def positional_encoding_np(positions, d):
    pos = np.arange(positions)[:, None].astype(np.float64)
    i = np.arange(d)[None, :].astype(np.float64)
    angle_rads = pos / np.power(10000.0, 2 * (i // 2) / d)
    angle_rads[:, 0::2] = np.sin(angle_rads[:, 0::2])
    angle_rads[:, 1::2] = np.cos(angle_rads[:, 1::2])
    return jnp.asarray(angle_rads[None, ...], dtype=jnp.float32)    # (1, P, d)


def build_flat_attention_mask(B, S):
    """Additive mask over flattened (B*S) rows/cols:
    0 where same batch element AND key position <= query position, else -1e9."""
    idx = np.arange(B * S)
    rb, cb = idx[:, None] // S, idx[None, :] // S
    rp, cp = idx[:, None] % S, idx[None, :] % S
    allowed = (rb == cb) & (cp <= rp)
    return jnp.asarray(np.where(allowed, 0.0, -1e9), dtype=jnp.float32)


def xavier_normal(key, fan_in, fan_out, shape):
    std = (2.0 / (fan_in + fan_out)) ** 0.5
    return std * jax.random.normal(key, shape, dtype=jnp.float32)


def init_params(key, *, num_items, num_items_out, num_layers, embedding_dim,
                hidden_size):
    E, Hd = embedding_dim, hidden_size
    n_keys = len(num_items) + 6 * num_layers + len(num_items_out)
    keys = iter(jax.random.split(key, n_keys))

    params = {}
    params['embeddings'] = [
        xavier_normal(next(keys), E, n, (n, E)) for n in num_items
    ]

    layers = []
    for _ in range(num_layers):
        lp = {
            'wq': xavier_normal(next(keys), E, E, (E, E)),
            'wk': xavier_normal(next(keys), E, E, (E, E)),
            'wv': xavier_normal(next(keys), E, E, (E, E)),
            'bq': jnp.zeros((1, E), jnp.float32),
            'bk': jnp.zeros((1, E), jnp.float32),
            'bv': jnp.zeros((1, E), jnp.float32),
            'wo': xavier_normal(next(keys), E, E, (E, E)),
            'bo': jnp.zeros((1, E), jnp.float32),
            'g1': jnp.ones((1, E), jnp.float32),
            'be1': jnp.zeros((1, E), jnp.float32),
            'w1': xavier_normal(next(keys), E, Hd, (E, Hd)),
            'b1': jnp.zeros((1, Hd), jnp.float32),
            'w2': xavier_normal(next(keys), Hd, E, (Hd, E)),
            'b2': jnp.zeros((1, E), jnp.float32),
            'g3': jnp.ones((1, E), jnp.float32),
            'be3': jnp.zeros((1, E), jnp.float32),
        }
        layers.append(lp)
    params['layers'] = layers

    params['classifier'] = [
        (xavier_normal(next(keys), E, n, (E, n)), jnp.zeros((1, n), jnp.float32))
        for n in num_items_out
    ]
    return params


def pack_params(params):
    """Stack per-layer weights along a leading L axis, with fused QKV."""
    layers = params['layers']
    return {
        'wqkv': jnp.stack([jnp.concatenate([lp['wq'], lp['wk'], lp['wv']], axis=1)
                           for lp in layers]),
        'bqkv': jnp.stack([jnp.concatenate([lp['bq'], lp['bk'], lp['bv']], axis=1)
                           for lp in layers]),
        'wo': jnp.stack([lp['wo'] for lp in layers]),
        'bo': jnp.stack([lp['bo'] for lp in layers]),
        'g1': jnp.stack([lp['g1'] for lp in layers]),
        'be1': jnp.stack([lp['be1'] for lp in layers]),
        'w1': jnp.stack([lp['w1'] for lp in layers]),
        'b1': jnp.stack([lp['b1'] for lp in layers]),
        'w2': jnp.stack([lp['w2'] for lp in layers]),
        'b2': jnp.stack([lp['b2'] for lp in layers]),
        'g3': jnp.stack([lp['g3'] for lp in layers]),
        'be3': jnp.stack([lp['be3'] for lp in layers]),
    }


def pack_classifier(classifier, seq_len, lane_multiple=128):
    """Concatenate the first `seq_len` classifier heads along the output axis and
    pad lanes to a multiple of 128 (lane-dense store)."""
    heads = classifier[:seq_len]
    sizes = [int(w.shape[1]) for (w, _) in heads]
    total = int(sum(sizes))
    n_pad = max(lane_multiple,
                ((total + lane_multiple - 1) // lane_multiple) * lane_multiple)
    wc = jnp.concatenate([w for (w, _) in heads], axis=1)
    bc = jnp.concatenate([b for (_, b) in heads], axis=1)
    wc = jnp.pad(wc, ((0, 0), (0, n_pad - total)))
    bc = jnp.pad(bc, ((0, 0), (0, n_pad - total)))
    offsets = [0]
    for s in sizes:
        offsets.append(offsets[-1] + s)
    return wc, bc, offsets


def embed_inputs(params, inp, noise, pos_enc, embedding_dim):
    """Decoder embedding + sqrt(E) scale + x[:,0]=noise[:,0] + positional enc."""
    B, S = inp.shape
    E = embedding_dim
    emb = params['embeddings']
    parts = [jnp.take(emb[0], inp[:, 0], axis=0)[:, None, :]]
    for i in range(S - 1):
        parts.append(jnp.take(emb[i], inp[:, i + 1], axis=0)[:, None, :])
    x = jnp.concatenate(parts, axis=1) * jnp.sqrt(jnp.float32(E))     # (B,S,E)
    x = x.at[:, 0].set(noise[:, 0])
    x = x + pos_enc[:, :S, :]
    # dropout: identity (inference)
    return x


def generator_forward(params, packed, wc, bc, cls_offsets, inp, noise, pos_enc,
                      mask_add, *, num_heads, embedding_dim):
    """Mirrors Generator.forward (inference; padding masks None)."""
    B, S = inp.shape
    x = embed_inputs(params, inp, noise, pos_enc, embedding_dim)
    out = run_fused_generator(x.reshape(B * S, embedding_dim), mask_add,
                              packed, wc, bc, num_heads=num_heads)
    out = out.reshape(B, S, -1)
    return [out[:, i, cls_offsets[i]:cls_offsets[i + 1]] for i in range(S)]


# ---------------------------------------------------------------------------
# Pure-JAX reference (for numerical validation of the fused kernel)
# ---------------------------------------------------------------------------
def reference_forward(params, inp, noise, pos_enc, *, num_heads, embedding_dim):
    B, S = inp.shape
    E = embedding_dim
    H = num_heads
    Dh = E // H
    x = embed_inputs(params, inp, noise, pos_enc, E)

    causal = jnp.asarray(
        np.where(np.triu(np.ones((S, S)), k=1) > 0, -1e9, 0.0), jnp.float32)

    def layernorm(z, g, b):
        mu = jnp.mean(z, axis=-1, keepdims=True)
        var = jnp.mean((z - mu) ** 2, axis=-1, keepdims=True)
        return (z - mu) / jnp.sqrt(var + 1e-6) * g + b

    def split(t):
        return t.reshape(B, S, H, Dh).transpose(0, 2, 1, 3)

    for lp in params['layers']:
        q = x @ lp['wq'] + lp['bq']
        k = x @ lp['wk'] + lp['bk']
        v = x @ lp['wv'] + lp['bv']
        qh, kh, vh = split(q), split(k), split(v)
        scores = jnp.einsum('bhqd,bhkd->bhqk', qh, kh) / jnp.sqrt(jnp.float32(Dh))
        scores = scores + causal[None, None]
        p = jax.nn.softmax(scores, axis=-1)
        attn = jnp.einsum('bhqk,bhkd->bhqd', p, vh)
        attn = attn.transpose(0, 2, 1, 3).reshape(B, S, E)
        attn = attn @ lp['wo'] + lp['bo']
        out1 = layernorm(attn + x, lp['g1'], lp['be1'])
        hidden = jnp.maximum(out1 @ lp['w1'] + lp['b1'], 0.0)
        ffn = hidden @ lp['w2'] + lp['b2']
        x = layernorm(ffn + out1, lp['g3'], lp['be3'])

    return [x[:, i] @ w + b for i, (w, b) in enumerate(params['classifier'][:S])]


# ---------------------------------------------------------------------------
if __name__ == "__main__":
    # Small, forward-consistent shapes
    B = 2                       # batch
    S = 5                       # seq == max_item_list_length
    E = 32                      # embedding_dim
    HIDDEN = 32                 # hidden_size == fully_connected_dim (must equal E
                                #   because LayerNorm(fcd) is applied to E-dim tensors)
    NUM_HEADS = 4
    NUM_LAYERS = 2
    num_items = [12, 13, 14, 15]          # >= S-1 embedding tables
    num_items_out = [10, 11, 12, 13, 14]  # one classifier head per position

    key = jax.random.PRNGKey(0)
    k_params, k_inp, k_noise = jax.random.split(key, 3)

    params = init_params(k_params, num_items=num_items, num_items_out=num_items_out,
                         num_layers=NUM_LAYERS, embedding_dim=E, hidden_size=HIDDEN)
    packed = pack_params(params)
    wc, bc, cls_offsets = pack_classifier(params['classifier'], S)

    inp = jax.random.randint(k_inp, (B, S), 0, min(num_items) - 1, dtype=jnp.int32)
    noise = jax.random.normal(k_noise, (B, 1, E), dtype=jnp.float32)

    pos_enc = positional_encoding_np(S, E)
    mask_add = build_flat_attention_mask(B, S)

    logits = generator_forward(params, packed, wc, bc, cls_offsets, inp, noise,
                               pos_enc, mask_add,
                               num_heads=NUM_HEADS, embedding_dim=E)
    ref_logits = reference_forward(params, inp, noise, pos_enc,
                                   num_heads=NUM_HEADS, embedding_dim=E)

    for i, (l, r) in enumerate(zip(logits, ref_logits)):
        jax.block_until_ready(l)
        assert l.shape == (B, num_items_out[i]), (l.shape, num_items_out[i])
        assert bool(jnp.all(jnp.isfinite(l)))
        np.testing.assert_allclose(np.asarray(l), np.asarray(r),
                                   rtol=2e-2, atol=2e-2)

    print("KERNEL_OK")
</pallas_src>

<mosaic_0001>
module attributes {stable_mosaic.version = 11 : i64} {
  func.func @fused_generator_kernel(%arg0: i32, %arg1: memref<10x32xf32, #tpu.memory_space<vmem>>, %arg2: memref<10x10xf32, #tpu.memory_space<vmem>>, %arg3: memref<1x32x96xf32, #tpu.memory_space<vmem>>, %arg4: memref<1x1x96xf32, #tpu.memory_space<vmem>>, %arg5: memref<1x32x32xf32, #tpu.memory_space<vmem>>, %arg6: memref<1x1x32xf32, #tpu.memory_space<vmem>>, %arg7: memref<1x1x32xf32, #tpu.memory_space<vmem>>, %arg8: memref<1x1x32xf32, #tpu.memory_space<vmem>>, %arg9: memref<1x32x32xf32, #tpu.memory_space<vmem>>, %arg10: memref<1x1x32xf32, #tpu.memory_space<vmem>>, %arg11: memref<1x32x32xf32, #tpu.memory_space<vmem>>, %arg12: memref<1x1x32xf32, #tpu.memory_space<vmem>>, %arg13: memref<1x1x32xf32, #tpu.memory_space<vmem>>, %arg14: memref<1x1x32xf32, #tpu.memory_space<vmem>>, %arg15: memref<32x128xf32, #tpu.memory_space<vmem>>, %arg16: memref<1x128xf32, #tpu.memory_space<vmem>>, %arg17: memref<10x128xf32, #tpu.memory_space<vmem>>, %arg18: memref<10x32xf32, #tpu.memory_space<vmem>>) attributes {dimension_semantics = [#tpu.dimension_semantics<arbitrary>], iteration_bounds = array<i64: 2>, scalar_prefetch = 0 : i64, scratch_operands = 1 : i64, tpu.core_type = #tpu.core_type<tc>, window_params = [{pipeline_mode = #tpu.pipeline_mode<synchronous>, transform_indices = @transform_0, window_bounds = array<i64: 10, 32>}, {pipeline_mode = #tpu.pipeline_mode<synchronous>, transform_indices = @transform_1, window_bounds = array<i64: 10, 10>}, {transform_indices = @transform_2, window_bounds = array<i64: 1, 32, 96>}, {transform_indices = @transform_3, window_bounds = array<i64: 1, 1, 96>}, {transform_indices = @transform_4, window_bounds = array<i64: 1, 32, 32>}, {transform_indices = @transform_5, window_bounds = array<i64: 1, 1, 32>}, {transform_indices = @transform_6, window_bounds = array<i64: 1, 1, 32>}, {transform_indices = @transform_7, window_bounds = array<i64: 1, 1, 32>}, {transform_indices = @transform_8, window_bounds = array<i64: 1, 32, 32>}, {transform_indices = @transform_9, window_bounds = array<i64: 1, 1, 32>}, {transform_indices = @transform_10, window_bounds = array<i64: 1, 32, 32>}, {transform_indices = @transform_11, window_bounds = array<i64: 1, 1, 32>}, {transform_indices = @transform_12, window_bounds = array<i64: 1, 1, 32>}, {transform_indices = @transform_13, window_bounds = array<i64: 1, 1, 32>}, {pipeline_mode = #tpu.pipeline_mode<synchronous>, transform_indices = @transform_14, window_bounds = array<i64: 32, 128>}, {pipeline_mode = #tpu.pipeline_mode<synchronous>, transform_indices = @transform_15, window_bounds = array<i64: 1, 128>}, {pipeline_mode = #tpu.pipeline_mode<synchronous>, transform_indices = @transform_16, window_bounds = array<i64: 10, 128>}]} {
    %c0_i32 = arith.constant 0 : i32
    %0 = arith.cmpi eq, %arg0, %c0_i32 : i32
    %1 = arith.extui %0 : i1 to i32
    %c0_i32_0 = arith.constant 0 : i32
    %2 = arith.cmpi ne, %1, %c0_i32_0 : i32
    scf.if %2 {
      %c0_78 = arith.constant 0 : index
      %c0_79 = arith.constant 0 : index
      %178 = vector.load %arg1[%c0_78, %c0_79] : memref<10x32xf32, #tpu.memory_space<vmem>>, vector<10x32xf32>
      %c0_80 = arith.constant 0 : index
      %c0_81 = arith.constant 0 : index
      %179 = vector.load %arg18[%c0_80, %c0_81] : memref<10x32xf32, #tpu.memory_space<vmem>>, vector<10x32xf32>
      tpu.vector_store %arg18[%c0_80, %c0_81], %178 {strides = array<i32>} : memref<10x32xf32, #tpu.memory_space<vmem>>, vector<10x32xf32>,
    } else {
    }
    %c0 = arith.constant 0 : index
    %c0_1 = arith.constant 0 : index
    %3 = vector.load %arg18[%c0, %c0_1] : memref<10x32xf32, #tpu.memory_space<vmem>>, vector<10x32xf32>
    %c0_2 = arith.constant 0 : index
    %c0_3 = arith.constant 0 : index
    %c0_4 = arith.constant 0 : index
    %4 = vector.load %arg3[%c0_2, %c0_3, %c0_4] : memref<1x32x96xf32, #tpu.memory_space<vmem>>, vector<1x32x96xf32>
    %5 = vector.shape_cast %4 : vector<1x32x96xf32> to vector<32x96xf32>
    %cst = arith.constant dense<0.000000e+00> : vector<10x96xf32>
    %6 = tpu.matmul %3, %5, %cst {dimension_numbers = #tpu.dot_dimension_numbers<[1], [0], [0], [1], [0, 0, 1, 1], [], []>} : vector<10x32xf32>, vector<32x96xf32>, vector<10x96xf32> -> vector<10x96xf32>
    %c0_5 = arith.constant 0 : index
    %c0_6 = arith.constant 0 : index
    %c0_7 = arith.constant 0 : index
    %7 = vector.load %arg4[%c0_5, %c0_6, %c0_7] : memref<1x1x96xf32, #tpu.memory_space<vmem>>, vector<1x1x96xf32>
    %8 = vector.shape_cast %7 : vector<1x1x96xf32> to vector<1x96xf32>
    %9 = vector.broadcast %8 : vector<1x96xf32> to vector<10x96xf32>
    %10 = arith.addf %6, %9 : vector<10x96xf32>
    %11 = vector.extract_strided_slice %10 {offsets = [0, 0], sizes = [10, 32], strides = [1, 1]} : vector<10x96xf32> to vector<10x32xf32>
    %cst_8 = arith.constant 0.353553385 : f32
    %12 = vector.broadcast %cst_8 : f32 to vector<10x32xf32>
    %13 = arith.mulf %11, %12 : vector<10x32xf32>
    %14 = vector.extract_strided_slice %10 {offsets = [0, 32], sizes = [10, 32], strides = [1, 1]} : vector<10x96xf32> to vector<10x32xf32>
    %15 = vector.extract_strided_slice %10 {offsets = [0, 64], sizes = [10, 32], strides = [1, 1]} : vector<10x96xf32> to vector<10x32xf32>
    %c0_9 = arith.constant 0 : index
    %c0_10 = arith.constant 0 : index
    %16 = vector.load %arg2[%c0_9, %c0_10] : memref<10x10xf32, #tpu.memory_space<vmem>>, vector<10x10xf32>
    %c0_11 = arith.constant 0 : index
    %c0_12 = arith.constant 0 : index
    %c0_13 = arith.constant 0 : index
    %17 = vector.load %arg5[%c0_11, %c0_12, %c0_13] : memref<1x32x32xf32, #tpu.memory_space<vmem>>, vector<1x32x32xf32>
    %18 = vector.shape_cast %17 : vector<1x32x32xf32> to vector<32x32xf32>
    %cst_14 = arith.constant 0.000000e+00 : f32
    %19 = vector.broadcast %cst_14 : f32 to vector<10x32xf32>
    %20 = vector.extract_strided_slice %13 {offsets = [0, 0], sizes = [10, 8], strides = [1, 1]} : vector<10x32xf32> to vector<10x8xf32>
    %21 = vector.extract_strided_slice %14 {offsets = [0, 0], sizes = [10, 8], strides = [1, 1]} : vector<10x32xf32> to vector<10x8xf32>
    %22 = vector.extract_strided_slice %15 {offsets = [0, 0], sizes = [10, 8], strides = [1, 1]} : vector<10x32xf32> to vector<10x8xf32>
    %23 = tpu.transpose %21, [1, 0] : vector<10x8xf32> -> vector<8x10xf32>
    %cst_15 = arith.constant dense<0.000000e+00> : vector<10x10xf32>
    %24 = tpu.matmul %20, %23, %cst_15 {dimension_numbers = #tpu.dot_dimension_numbers<[1], [0], [0], [1], [0, 0, 1, 1], [], []>} : vector<10x8xf32>, vector<8x10xf32>, vector<10x10xf32> -> vector<10x10xf32>
    %25 = arith.addf %24, %16 : vector<10x10xf32>
    %cst_16 = arith.constant dense<0xFF800000> : vector<10xf32>
    %26 = vector.multi_reduction <maximumf>, %25, %cst_16 [1] : vector<10x10xf32> to vector<10xf32>
    %27 = vector.shape_cast %26 : vector<10xf32> to vector<10x1xf32>
    %28 = vector.broadcast %27 : vector<10x1xf32> to vector<10x10xf32>
    %29 = arith.subf %25, %28 : vector<10x10xf32>
    %30 = math.exp %29 : vector<10x10xf32>
    %cst_17 = arith.constant dense<0.000000e+00> : vector<10xf32>
    %31 = vector.multi_reduction <add>, %30, %cst_17 [1] : vector<10x10xf32> to vector<10xf32>
    %32 = vector.shape_cast %31 : vector<10xf32> to vector<10x1xf32>
    %33 = tpu.reciprocal %32 {approx = true} : vector<10x1xf32> -> vector<10x1xf32>
    %34 = vector.broadcast %33 : vector<10x1xf32> to vector<10x10xf32>
    %35 = arith.mulf %30, %34 : vector<10x10xf32>
    %cst_18 = arith.constant dense<0.000000e+00> : vector<10x8xf32>
    %36 = tpu.matmul %35, %22, %cst_18 {dimension_numbers = #tpu.dot_dimension_numbers<[1], [0], [0], [1], [0, 0, 1, 1], [], []>} : vector<10x10xf32>, vector<10x8xf32>, vector<10x8xf32> -> vector<10x8xf32>
    %37 = vector.extract_strided_slice %18 {offsets = [0, 0], sizes = [8, 32], strides = [1, 1]} : vector<32x32xf32> to vector<8x32xf32>
    %cst_19 = arith.constant dense<0.000000e+00> : vector<10x32xf32>
    %38 = tpu.matmul %36, %37, %cst_19 {dimension_numbers = #tpu.dot_dimension_numbers<[1], [0], [0], [1], [0, 0, 1, 1], [], []>} : vector<10x8xf32>, vector<8x32xf32>, vector<10x32xf32> -> vector<10x32xf32>
    %39 = arith.addf %19, %38 : vector<10x32xf32>
    %40 = vector.extract_strided_slice %13 {offsets = [0, 8], sizes = [10, 8], strides = [1, 1]} : vector<10x32xf32> to vector<10x8xf32>
    %41 = vector.extract_strided_slice %14 {offsets = [0, 8], sizes = [10, 8], strides = [1, 1]} : vector<10x32xf32> to vector<10x8xf32>
    %42 = vector.extract_strided_slice %15 {offsets = [0, 8], sizes = [10, 8], strides = [1, 1]} : vector<10x32xf32> to vector<10x8xf32>
    %43 = tpu.transpose %41, [1, 0] : vector<10x8xf32> -> vector<8x10xf32>
    %cst_20 = arith.constant dense<0.000000e+00> : vector<10x10xf32>
    %44 = tpu.matmul %40, %43, %cst_20 {dimension_numbers = #tpu.dot_dimension_numbers<[1], [0], [0], [1], [0, 0, 1, 1], [], []>} : vector<10x8xf32>, vector<8x10xf32>, vector<10x10xf32> -> vector<10x10xf32>
    %45 = arith.addf %44, %16 : vector<10x10xf32>
    %cst_21 = arith.constant dense<0xFF800000> : vector<10xf32>
    %46 = vector.multi_reduction <maximumf>, %45, %cst_21 [1] : vector<10x10xf32> to vector<10xf32>
    %47 = vector.shape_cast %46 : vector<10xf32> to vector<10x1xf32>
    %48 = vector.broadcast %47 : vector<10x1xf32> to vector<10x10xf32>
    %49 = arith.subf %45, %48 : vector<10x10xf32>
    %50 = math.exp %49 : vector<10x10xf32>
    %cst_22 = arith.constant dense<0.000000e+00> : vector<10xf32>
    %51 = vector.multi_reduction <add>, %50, %cst_22 [1] : vector<10x10xf32> to vector<10xf32>
    %52 = vector.shape_cast %51 : vector<10xf32> to vector<10x1xf32>
    %53 = tpu.reciprocal %52 {approx = true} : vector<10x1xf32> -> vector<10x1xf32>
    %54 = vector.broadcast %53 : vector<10x1xf32> to vector<10x10xf32>
    %55 = arith.mulf %50, %54 : vector<10x10xf32>
    %cst_23 = arith.constant dense<0.000000e+00> : vector<10x8xf32>
    %56 = tpu.matmul %55, %42, %cst_23 {dimension_numbers = #tpu.dot_dimension_numbers<[1], [0], [0], [1], [0, 0, 1, 1], [], []>} : vector<10x10xf32>, vector<10x8xf32>, vector<10x8xf32> -> vector<10x8xf32>
    %57 = vector.extract_strided_slice %18 {offsets = [8, 0], sizes = [8, 32], strides = [1, 1]} : vector<32x32xf32> to vector<8x32xf32>
    %cst_24 = arith.constant dense<0.000000e+00> : vector<10x32xf32>
    %58 = tpu.matmul %56, %57, %cst_24 {dimension_numbers = #tpu.dot_dimension_numbers<[1], [0], [0], [1], [0, 0, 1, 1], [], []>} : vector<10x8xf32>, vector<8x32xf32>, vector<10x32xf32> -> vector<10x32xf32>
    %59 = arith.addf %39, %58 : vector<10x32xf32>
    %60 = vector.extract_strided_slice %13 {offsets = [0, 16], sizes = [10, 8], strides = [1, 1]} : vector<10x32xf32> to vector<10x8xf32>
    %61 = vector.extract_strided_slice %14 {offsets = [0, 16], sizes = [10, 8], strides = [1, 1]} : vector<10x32xf32> to vector<10x8xf32>
    %62 = vector.extract_strided_slice %15 {offsets = [0, 16], sizes = [10, 8], strides = [1, 1]} : vector<10x32xf32> to vector<10x8xf32>
    %63 = tpu.transpose %61, [1, 0] : vector<10x8xf32> -> vector<8x10xf32>
    %cst_25 = arith.constant dense<0.000000e+00> : vector<10x10xf32>
    %64 = tpu.matmul %60, %63, %cst_25 {dimension_numbers = #tpu.dot_dimension_numbers<[1], [0], [0], [1], [0, 0, 1, 1], [], []>} : vector<10x8xf32>, vector<8x10xf32>, vector<10x10xf32> -> vector<10x10xf32>
    %65 = arith.addf %64, %16 : vector<10x10xf32>
    %cst_26 = arith.constant dense<0xFF800000> : vector<10xf32>
    %66 = vector.multi_reduction <maximumf>, %65, %cst_26 [1] : vector<10x10xf32> to vector<10xf32>
    %67 = vector.shape_cast %66 : vector<10xf32> to vector<10x1xf32>
    %68 = vector.broadcast %67 : vector<10x1xf32> to vector<10x10xf32>
    %69 = arith.subf %65, %68 : vector<10x10xf32>
    %70 = math.exp %69 : vector<10x10xf32>
    %cst_27 = arith.constant dense<0.000000e+00> : vector<10xf32>
    %71 = vector.multi_reduction <add>, %70, %cst_27 [1] : vector<10x10xf32> to vector<10xf32>
    %72 = vector.shape_cast %71 : vector<10xf32> to vector<10x1xf32>
    %73 = tpu.reciprocal %72 {approx = true} : vector<10x1xf32> -> vector<10x1xf32>
    %74 = vector.broadcast %73 : vector<10x1xf32> to vector<10x10xf32>
    %75 = arith.mulf %70, %74 : vector<10x10xf32>
    %cst_28 = arith.constant dense<0.000000e+00> : vector<10x8xf32>
    %76 = tpu.matmul %75, %62, %cst_28 {dimension_numbers = #tpu.dot_dimension_numbers<[1], [0], [0], [1], [0, 0, 1, 1], [], []>} : vector<10x10xf32>, vector<10x8xf32>, vector<10x8xf32> -> vector<10x8xf32>
    %77 = vector.extract_strided_slice %18 {offsets = [16, 0], sizes = [8, 32], strides = [1, 1]} : vector<32x32xf32> to vector<8x32xf32>
    %cst_29 = arith.constant dense<0.000000e+00> : vector<10x32xf32>
    %78 = tpu.matmul %76, %77, %cst_29 {dimension_numbers = #tpu.dot_dimension_numbers<[1], [0], [0], [1], [0, 0, 1, 1], [], []>} : vector<10x8xf32>, vector<8x32xf32>, vector<10x32xf32> -> vector<10x32xf32>
    %79 = arith.addf %59, %78 : vector<10x32xf32>
    %80 = vector.extract_strided_slice %13 {offsets = [0, 24], sizes = [10, 8], strides = [1, 1]} : vector<10x32xf32> to vector<10x8xf32>
    %81 = vector.extract_strided_slice %14 {offsets = [0, 24], sizes = [10, 8], strides = [1, 1]} : vector<10x32xf32> to vector<10x8xf32>
    %82 = vector.extract_strided_slice %15 {offsets = [0, 24], sizes = [10, 8], strides = [1, 1]} : vector<10x32xf32> to vector<10x8xf32>
    %83 = tpu.transpose %81, [1, 0] : vector<10x8xf32> -> vector<8x10xf32>
    %cst_30 = arith.constant dense<0.000000e+00> : vector<10x10xf32>
    %84 = tpu.matmul %80, %83, %cst_30 {dimension_numbers = #tpu.dot_dimension_numbers<[1], [0], [0], [1], [0, 0, 1, 1], [], []>} : vector<10x8xf32>, vector<8x10xf32>, vector<10x10xf32> -> vector<10x10xf32>
    %85 = arith.addf %84, %16 : vector<10x10xf32>
    %cst_31 = arith.constant dense<0xFF800000> : vector<10xf32>
    %86 = vector.multi_reduction <maximumf>, %85, %cst_31 [1] : vector<10x10xf32> to vector<10xf32>
    %87 = vector.shape_cast %86 : vector<10xf32> to vector<10x1xf32>
    %88 = vector.broadcast %87 : vector<10x1xf32> to vector<10x10xf32>
    %89 = arith.subf %85, %88 : vector<10x10xf32>
    %90 = math.exp %89 : vector<10x10xf32>
    %cst_32 = arith.constant dense<0.000000e+00> : vector<10xf32>
    %91 = vector.multi_reduction <add>, %90, %cst_32 [1] : vector<10x10xf32> to vector<10xf32>
    %92 = vector.shape_cast %91 : vector<10xf32> to vector<10x1xf32>
    %93 = tpu.reciprocal %92 {approx = true} : vector<10x1xf32> -> vector<10x1xf32>
    %94 = vector.broadcast %93 : vector<10x1xf32> to vector<10x10xf32>
    %95 = arith.mulf %90, %94 : vector<10x10xf32>
    %cst_33 = arith.constant dense<0.000000e+00> : vector<10x8xf32>
    %96 = tpu.matmul %95, %82, %cst_33 {dimension_numbers = #tpu.dot_dimension_numbers<[1], [0], [0], [1], [0, 0, 1, 1], [], []>} : vector<10x10xf32>, vector<10x8xf32>, vector<10x8xf32> -> vector<10x8xf32>
    %97 = vector.extract_strided_slice %18 {offsets = [24, 0], sizes = [8, 32], strides = [1, 1]} : vector<32x32xf32> to vector<8x32xf32>
    %cst_34 = arith.constant dense<0.000000e+00> : vector<10x32xf32>
    %98 = tpu.matmul %96, %97, %cst_34 {dimension_numbers = #tpu.dot_dimension_numbers<[1], [0], [0], [1], [0, 0, 1, 1], [], []>} : vector<10x8xf32>, vector<8x32xf32>, vector<10x32xf32> -> vector<10x32xf32>
    %99 = arith.addf %79, %98 : vector<10x32xf32>
    %c0_35 = arith.constant 0 : index
    %c0_36 = arith.constant 0 : index
    %c0_37 = arith.constant 0 : index
    %100 = vector.load %arg6[%c0_35, %c0_36, %c0_37] : memref<1x1x32xf32, #tpu.memory_space<vmem>>, vector<1x1x32xf32>
    %101 = vector.shape_cast %100 : vector<1x1x32xf32> to vector<1x32xf32>
    %102 = vector.broadcast %101 : vector<1x32xf32> to vector<10x32xf32>
    %103 = arith.addf %99, %102 : vector<10x32xf32>
    %104 = arith.addf %103, %3 : vector<10x32xf32>
    %c0_38 = arith.constant 0 : index
    %c0_39 = arith.constant 0 : index
    %c0_40 = arith.constant 0 : index
    %105 = vector.load %arg7[%c0_38, %c0_39, %c0_40] : memref<1x1x32xf32, #tpu.memory_space<vmem>>, vector<1x1x32xf32>
    %106 = vector.shape_cast %105 : vector<1x1x32xf32> to vector<1x32xf32>
    %c0_41 = arith.constant 0 : index
    %c0_42 = arith.constant 0 : index
    %c0_43 = arith.constant 0 : index
    %107 = vector.load %arg8[%c0_41, %c0_42, %c0_43] : memref<1x1x32xf32, #tpu.memory_space<vmem>>, vector<1x1x32xf32>
    %108 = vector.shape_cast %107 : vector<1x1x32xf32> to vector<1x32xf32>
    %cst_44 = arith.constant dense<0.000000e+00> : vector<10xf32>
    %109 = vector.multi_reduction <add>, %104, %cst_44 [1] : vector<10x32xf32> to vector<10xf32>
    %110 = vector.shape_cast %109 : vector<10xf32> to vector<10x1xf32>
    %cst_45 = arith.constant 3.200000e+01 : f32
    %111 = vector.broadcast %cst_45 : f32 to vector<10x1xf32>
    %112 = arith.divf %110, %111 : vector<10x1xf32>
    %113 = vector.broadcast %112 : vector<10x1xf32> to vector<10x32xf32>
    %114 = arith.subf %104, %113 : vector<10x32xf32>
    %115 = arith.mulf %114, %114 : vector<10x32xf32>
    %cst_46 = arith.constant dense<0.000000e+00> : vector<10xf32>
    %116 = vector.multi_reduction <add>, %115, %cst_46 [1] : vector<10x32xf32> to vector<10xf32>
    %117 = vector.shape_cast %116 : vector<10xf32> to vector<10x1xf32>
    %cst_47 = arith.constant 3.200000e+01 : f32
    %118 = vector.broadcast %cst_47 : f32 to vector<10x1xf32>
    %119 = arith.divf %117, %118 : vector<10x1xf32>
    %120 = vector.broadcast %112 : vector<10x1xf32> to vector<10x32xf32>
    %121 = arith.subf %104, %120 : vector<10x32xf32>
    %cst_48 = arith.constant 9.99999997E-7 : f32
    %122 = vector.broadcast %cst_48 : f32 to vector<10x1xf32>
    %123 = arith.addf %119, %122 : vector<10x1xf32>
    %124 = math.rsqrt %123 : vector<10x1xf32>
    %125 = vector.broadcast %124 : vector<10x1xf32> to vector<10x32xf32>
    %126 = arith.mulf %121, %125 : vector<10x32xf32>
    %127 = vector.broadcast %106 : vector<1x32xf32> to vector<10x32xf32>
    %128 = arith.mulf %126, %127 : vector<10x32xf32>
    %129 = vector.broadcast %108 : vector<1x32xf32> to vector<10x32xf32>
    %130 = arith.addf %128, %129 : vector<10x32xf32>
    %c0_49 = arith.constant 0 : index
    %c0_50 = arith.constant 0 : index
    %c0_51 = arith.constant 0 : index
    %131 = vector.load %arg9[%c0_49, %c0_50, %c0_51] : memref<1x32x32xf32, #tpu.memory_space<vmem>>, vector<1x32x32xf32>
    %132 = vector.shape_cast %131 : vector<1x32x32xf32> to vector<32x32xf32>
    %cst_52 = arith.constant dense<0.000000e+00> : vector<10x32xf32>
    %133 = tpu.matmul %130, %132, %cst_52 {dimension_numbers = #tpu.dot_dimension_numbers<[1], [0], [0], [1], [0, 0, 1, 1], [], []>} : vector<10x32xf32>, vector<32x32xf32>, vector<10x32xf32> -> vector<10x32xf32>
    %c0_53 = arith.constant 0 : index
    %c0_54 = arith.constant 0 : index
    %c0_55 = arith.constant 0 : index
    %134 = vector.load %arg10[%c0_53, %c0_54, %c0_55] : memref<1x1x32xf32, #tpu.memory_space<vmem>>, vector<1x1x32xf32>
    %135 = vector.shape_cast %134 : vector<1x1x32xf32> to vector<1x32xf32>
    %136 = vector.broadcast %135 : vector<1x32xf32> to vector<10x32xf32>
    %137 = arith.addf %133, %136 : vector<10x32xf32>
    %cst_56 = arith.constant 0.000000e+00 : f32
    %138 = vector.broadcast %cst_56 : f32 to vector<10x32xf32>
    %139 = arith.maximumf %137, %138 : vector<10x32xf32>
    %c0_57 = arith.constant 0 : index
    %c0_58 = arith.constant 0 : index
    %c0_59 = arith.constant 0 : index
    %140 = vector.load %arg11[%c0_57, %c0_58, %c0_59] : memref<1x32x32xf32, #tpu.memory_space<vmem>>, vector<1x32x32xf32>
    %141 = vector.shape_cast %140 : vector<1x32x32xf32> to vector<32x32xf32>
    %cst_60 = arith.constant dense<0.000000e+00> : vector<10x32xf32>
    %142 = tpu.matmul %139, %141, %cst_60 {dimension_numbers = #tpu.dot_dimension_numbers<[1], [0], [0], [1], [0, 0, 1, 1], [], []>} : vector<10x32xf32>, vector<32x32xf32>, vector<10x32xf32> -> vector<10x32xf32>
    %c0_61 = arith.constant 0 : index
    %c0_62 = arith.constant 0 : index
    %c0_63 = arith.constant 0 : index
    %143 = vector.load %arg12[%c0_61, %c0_62, %c0_63] : memref<1x1x32xf32, #tpu.memory_space<vmem>>, vector<1x1x32xf32>
    %144 = vector.shape_cast %143 : vector<1x1x32xf32> to vector<1x32xf32>
    %145 = vector.broadcast %144 : vector<1x32xf32> to vector<10x32xf32>
    %146 = arith.addf %142, %145 : vector<10x32xf32>
    %147 = arith.addf %146, %130 : vector<10x32xf32>
    %c0_64 = arith.constant 0 : index
    %c0_65 = arith.constant 0 : index
    %c0_66 = arith.constant 0 : index
    %148 = vector.load %arg13[%c0_64, %c0_65, %c0_66] : memref<1x1x32xf32, #tpu.memory_space<vmem>>, vector<1x1x32xf32>
    %149 = vector.shape_cast %148 : vector<1x1x32xf32> to vector<1x32xf32>
    %c0_67 = arith.constant 0 : index
    %c0_68 = arith.constant 0 : index
    %c0_69 = arith.constant 0 : index
    %150 = vector.load %arg14[%c0_67, %c0_68, %c0_69] : memref<1x1x32xf32, #tpu.memory_space<vmem>>, vector<1x1x32xf32>
    %151 = vector.shape_cast %150 : vector<1x1x32xf32> to vector<1x32xf32>
    %cst_70 = arith.constant dense<0.000000e+00> : vector<10xf32>
    %152 = vector.multi_reduction <add>, %147, %cst_70 [1] : vector<10x32xf32> to vector<10xf32>
    %153 = vector.shape_cast %152 : vector<10xf32> to vector<10x1xf32>
    %cst_71 = arith.constant 3.200000e+01 : f32
    %154 = vector.broadcast %cst_71 : f32 to vector<10x1xf32>
    %155 = arith.divf %153, %154 : vector<10x1xf32>
    %156 = vector.broadcast %155 : vector<10x1xf32> to vector<10x32xf32>
    %157 = arith.subf %147, %156 : vector<10x32xf32>
    %158 = arith.mulf %157, %157 : vector<10x32xf32>
    %cst_72 = arith.constant dense<0.000000e+00> : vector<10xf32>
    %159 = vector.multi_reduction <add>, %158, %cst_72 [1] : vector<10x32xf32> to vector<10xf32>
    %160 = vector.shape_cast %159 : vector<10xf32> to vector<10x1xf32>
    %cst_73 = arith.constant 3.200000e+01 : f32
    %161 = vector.broadcast %cst_73 : f32 to vector<10x1xf32>
    %162 = arith.divf %160, %161 : vector<10x1xf32>
    %163 = vector.broadcast %155 : vector<10x1xf32> to vector<10x32xf32>
    %164 = arith.subf %147, %163 : vector<10x32xf32>
    %cst_74 = arith.constant 9.99999997E-7 : f32
    %165 = vector.broadcast %cst_74 : f32 to vector<10x1xf32>
    %166 = arith.addf %162, %165 : vector<10x1xf32>
    %167 = math.rsqrt %166 : vector<10x1xf32>
    %168 = vector.broadcast %167 : vector<10x1xf32> to vector<10x32xf32>
    %169 = arith.mulf %164, %168 : vector<10x32xf32>
    %170 = vector.broadcast %149 : vector<1x32xf32> to vector<10x32xf32>
    %171 = arith.mulf %169, %170 : vector<10x32xf32>
    %172 = vector.broadcast %151 : vector<1x32xf32> to vector<10x32xf32>
    %173 = arith.addf %171, %172 : vector<10x32xf32>
    %c0_75 = arith.constant 0 : index
    %c0_76 = arith.constant 0 : index
    %174 = vector.load %arg18[%c0_75, %c0_76] : memref<10x32xf32, #tpu.memory_space<vmem>>, vector<10x32xf32>
    tpu.vector_store %arg18[%c0_75, %c0_76], %173 {strides = array<i32>} : memref<10x32xf32, #tpu.memory_space<vmem>>, vector<10x32xf32>,
    %c1_i32 = arith.constant 1 : i32
    %175 = arith.cmpi eq, %arg0, %c1_i32 : i32
    %176 = arith.extui %175 : i1 to i32
    %c0_i32_77 = arith.constant 0 : i32
    %177 = arith.cmpi ne, %176, %c0_i32_77 : i32
    scf.if %177 {
      %c0_78 = arith.constant 0 : index
      %c0_79 = arith.constant 0 : index
      %178 = vector.load %arg15[%c0_78, %c0_79] : memref<32x128xf32, #tpu.memory_space<vmem>>, vector<32x128xf32>
      %cst_80 = arith.constant dense<0.000000e+00> : vector<10x128xf32>
      %179 = tpu.matmul %173, %178, %cst_80 {dimension_numbers = #tpu.dot_dimension_numbers<[1], [0], [0], [1], [0, 0, 1, 1], [], []>} : vector<10x32xf32>, vector<32x128xf32>, vector<10x128xf32> -> vector<10x128xf32>
      %c0_81 = arith.constant 0 : index
      %c0_82 = arith.constant 0 : index
      %180 = vector.load %arg16[%c0_81, %c0_82] : memref<1x128xf32, #tpu.memory_space<vmem>>, vector<1x128xf32>
      %181 = vector.broadcast %180 : vector<1x128xf32> to vector<10x128xf32>
      %182 = arith.addf %179, %181 : vector<10x128xf32>
      %c0_83 = arith.constant 0 : index
      %c0_84 = arith.constant 0 : index
      %183 = vector.load %arg17[%c0_83, %c0_84] : memref<10x128xf32, #tpu.memory_space<vmem>>, vector<10x128xf32>
      tpu.vector_store %arg17[%c0_83, %c0_84], %182 {strides = array<i32>} : memref<10x128xf32, #tpu.memory_space<vmem>>, vector<10x128xf32>,
    } else {
    }
    return
  }
  func.func @transform_0(%arg0: i32) -> (i32, i32) {
    %c0_i32 = arith.constant 0 : i32
    %c0_i32_0 = arith.constant 0 : i32
    %c0_i32_1 = arith.constant 0 : i32
    return %c0_i32, %c0_i32_0 : i32, i32
  }
  func.func @transform_1(%arg0: i32) -> (i32, i32) {
    %c0_i32 = arith.constant 0 : i32
    %c0_i32_0 = arith.constant 0 : i32
    %c0_i32_1 = arith.constant 0 : i32
    return %c0_i32, %c0_i32_0 : i32, i32
  }
  func.func @transform_2(%arg0: i32) -> (i32, i32, i32) {
    %c0_i32 = arith.constant 0 : i32
    %c0_i32_0 = arith.constant 0 : i32
    %c0_i32_1 = arith.constant 0 : i32
    return %arg0, %c0_i32, %c0_i32_0 : i32, i32, i32
  }
  func.func @transform_3(%arg0: i32) -> (i32, i32, i32) {
    %c0_i32 = arith.constant 0 : i32
    %c0_i32_0 = arith.constant 0 : i32
    %c0_i32_1 = arith.constant 0 : i32
    return %arg0, %c0_i32, %c0_i32_0 : i32, i32, i32
  }
  func.func @transform_4(%arg0: i32) -> (i32, i32, i32) {
    %c0_i32 = arith.constant 0 : i32
    %c0_i32_0 = arith.constant 0 : i32
    %c0_i32_1 = arith.constant 0 : i32
    return %arg0, %c0_i32, %c0_i32_0 : i32, i32, i32
  }
  func.func @transform_5(%arg0: i32) -> (i32, i32, i32) {
    %c0_i32 = arith.constant 0 : i32
    %c0_i32_0 = arith.constant 0 : i32
    %c0_i32_1 = arith.constant 0 : i32
    return %arg0, %c0_i32, %c0_i32_0 : i32, i32, i32
  }
  func.func @transform_6(%arg0: i32) -> (i32, i32, i32) {
    %c0_i32 = arith.constant 0 : i32
    %c0_i32_0 = arith.constant 0 : i32
    %c0_i32_1 = arith.constant 0 : i32
    return %arg0, %c0_i32, %c0_i32_0 : i32, i32, i32
  }
  func.func @transform_7(%arg0: i32) -> (i32, i32, i32) {
    %c0_i32 = arith.constant 0 : i32
    %c0_i32_0 = arith.constant 0 : i32
    %c0_i32_1 = arith.constant 0 : i32
    return %arg0, %c0_i32, %c0_i32_0 : i32, i32, i32
  }
  func.func @transform_8(%arg0: i32) -> (i32, i32, i32) {
    %c0_i32 = arith.constant 0 : i32
    %c0_i32_0 = arith.constant 0 : i32
    %c0_i32_1 = arith.constant 0 : i32
    return %arg0, %c0_i32, %c0_i32_0 : i32, i32, i32
  }
  func.func @transform_9(%arg0: i32) -> (i32, i32, i32) {
    %c0_i32 = arith.constant 0 : i32
    %c0_i32_0 = arith.constant 0 : i32
    %c0_i32_1 = arith.constant 0 : i32
    return %arg0, %c0_i32, %c0_i32_0 : i32, i32, i32
  }
  func.func @transform_10(%arg0: i32) -> (i32, i32, i32) {
    %c0_i32 = arith.constant 0 : i32
    %c0_i32_0 = arith.constant 0 : i32
    %c0_i32_1 = arith.constant 0 : i32
    return %arg0, %c0_i32, %c0_i32_0 : i32, i32, i32
  }
  func.func @transform_11(%arg0: i32) -> (i32, i32, i32) {
    %c0_i32 = arith.constant 0 : i32
    %c0_i32_0 = arith.constant 0 : i32
    %c0_i32_1 = arith.constant 0 : i32
    return %arg0, %c0_i32, %c0_i32_0 : i32, i32, i32
  }
  func.func @transform_12(%arg0: i32) -> (i32, i32, i32) {
    %c0_i32 = arith.constant 0 : i32
    %c0_i32_0 = arith.constant 0 : i32
    %c0_i32_1 = arith.constant 0 : i32
    return %arg0, %c0_i32, %c0_i32_0 : i32, i32, i32
  }
  func.func @transform_13(%arg0: i32) -> (i32, i32, i32) {
    %c0_i32 = arith.constant 0 : i32
    %c0_i32_0 = arith.constant 0 : i32
    %c0_i32_1 = arith.constant 0 : i32
    return %arg0, %c0_i32, %c0_i32_0 : i32, i32, i32
  }
  func.func @transform_14(%arg0: i32) -> (i32, i32) {
    %c0_i32 = arith.constant 0 : i32
    %c0_i32_0 = arith.constant 0 : i32
    %c0_i32_1 = arith.constant 0 : i32
    return %c0_i32, %c0_i32_0 : i32, i32
  }
  func.func @transform_15(%arg0: i32) -> (i32, i32) {
    %c0_i32 = arith.constant 0 : i32
    %c0_i32_0 = arith.constant 0 : i32
    %c0_i32_1 = arith.constant 0 : i32
    return %c0_i32, %c0_i32_0 : i32, i32
  }
  func.func @transform_16(%arg0: i32) -> (i32, i32) {
    %c0_i32 = arith.constant 0 : i32
    %c0_i32_0 = arith.constant 0 : i32
    %c0_i32_1 = arith.constant 0 : i32
    return %c0_i32, %c0_i32_0 : i32, i32
  }
}

</mosaic_0001>

<bundles_post_ra>
// kernel: tpu_custom_call.1
= control target key start
LH: loop header
LB: loop body
LE: loop exit
PB: predicated region body
PF: predicated region fallthrough
CT: control target
= control target key end

     0   :  { %s4106_s0 = inlined_call_operand.hbm [shape: f32[10,32], index: 0, kind: input, shape index: {}]   ;;  %s4107_s1 = inlined_call_operand.hbm [shape: f32[10,10], index: 1, kind: input, shape index: {}]   ;;  %s4108_s2 = inlined_call_operand.hbm [shape: f32[2,32,96], index: 2, kind: input, shape index: {}]   ;;  %s4109_s3 = inlined_call_operand.vmem [shape: f32[2,1,96], index: 3, kind: input, shape index: {}]   ;;  %s4110_s4 = inlined_call_operand.hbm [shape: f32[2,32,32], index: 4, kind: input, shape index: {}]   ;;  %s4111_s5 = inlined_call_operand.vmem [shape: f32[2,1,32], index: 5, kind: input, shape index: {}]   ;;  %s4112_s6 = inlined_call_operand.vmem [shape: f32[2,1,32], index: 6, kind: input, shape index: {}]   ;;  %s4113_s7 = inlined_call_operand.vmem [shape: f32[2,1,32], index: 7, kind: input, shape index: {}]   ;;  %s4114_s8 = inlined_call_operand.hbm [shape: f32[2,32,32], index: 8, kind: input, shape index: {}]   ;;  %s4115_s9 = inlined_call_operand.vmem [shape: f32[2,1,32], index: 9, kind: input, shape index: {}]   ;;  %s4116_s10 = inlined_call_operand.hbm [shape: f32[2,32,32], index: 10, kind: input, shape index: {}]   ;;  %s4117_s11 = inlined_call_operand.vmem [shape: f32[2,1,32], index: 11, kind: input, shape index: {}]   ;;  %s4118_s12 = inlined_call_operand.vmem [shape: f32[2,1,32], index: 12, kind: input, shape index: {}]   ;;  %s4119_s13 = inlined_call_operand.vmem [shape: f32[2,1,32], index: 13, kind: input, shape index: {}]   ;;  %s4120_s14 = inlined_call_operand.vmem [shape: f32[32,128], index: 14, kind: input, shape index: {}]   ;;  %s4121_s15 = inlined_call_operand.vmem [shape: f32[1,128], index: 15, kind: input, shape index: {}]   ;;  %s4122_s16 = inlined_call_operand.hbm [shape: f32[10,128], index: 16, kind: output, shape index: {}]  }
   0x1   :  { %4144 = sst [smem:[#allocation20_spill]] %s4106_s0 }
   0x2   :  { %4145 = sst [smem:[#allocation21_spill]] %s4107_s1 }
   0x3   :  { %4146 = sst [smem:[#allocation22_spill]] %s4108_s2 }
   0x4   :  { %4147 = sst [smem:[#allocation23_spill]] %s4110_s4 }
   0x5   :  { %4148 = sst [smem:[#allocation24_spill]] %s4112_s6 }
   0x6   :  { %4149 = sst [smem:[#allocation25_spill]] %s4113_s7 }
   0x7   :  { %4150 = sst [smem:[#allocation26_spill]] %s4115_s9 }
   0x8   :  { %4151 = sst [smem:[#allocation27_spill]] %s4117_s11 }
   0x9   :  { %4152 = sst [smem:[#allocation28_spill]] %s4118_s12 }
   0xa   :  { %4153 = sst [smem:[#allocation29_spill]] %s4119_s13 }
   0xb   :  { %4154 = sst [smem:[#allocation30_spill]] %s4120_s14 }
   0xc   :  { %4155 = sst [smem:[#allocation31_spill]] %s4121_s15 }
   0xd   :  { %4156 = sst [smem:[#allocation32_spill]] %s4122_s16 }
   0xe   :  { %21 = vsyncpa [#allocation4], 0 }
   0xf   :  { %22 = vsyncpa [#allocation7], 0 }
  0x10   :  { %23 = vsyncpa [#allocation5], 0  ;;  %s3523_s21 = smov 0   ;;  %s3525_s22 = smov 0  }
  0x11   :  { %s3527_s23 = smov 0   ;;  %s3529_s24 = smov 0  }
  0x12 LB: > { %4157 = sst [smem:[#allocation17_spill]] %s3409_s23  ;;  %s3542_s25 = sadd.s32 4294967295, %s3413_s24   ;;  %s3413_s24 = sphi %s3529_s24, %s4207_s24   ;;  %s3409_s23 = sphi %s3527_s23, %s4209_s23   ;;  %s3405_s22 = sphi %s3525_s22, %s4211_s22   ;;  %s3401_s21 = sphi %s3523_s21, %s4210_s21  }
  0x13   : > { %s3545_s26 = sadd.s32 1, %s3413_s24   ;;  %s78_s28 = sadd.s32 1, %s3409_s23 }
  0x14   : > { %4158 = sst [smem:[#allocation18_spill]] %s3545_s26  ;;  %s75_s27 = ssub.s32 %s3413_s24, %s3545_s26 }
  0x15   : > { %p76_p0 = scmp.eq.s32.totalorder %s75_s27, 0  ;;  %p85_p1 = scmp.ne.s32.totalorder %s3409_s23, %s3405_s22 }
  0x16   : > { %p86_p2 = scmp.eq.s32.totalorder %s3413_s24, 0  ;;  %p91_p3 = scmp.ne.s32.totalorder %s3405_s22, %s3401_s21 }
  0x17   : > { %s3555_s29 = scalar_select %p76_p0, %s3409_s23, %s78_s28  }
  0x18   : > { %p3557_p4 = por %p86_p2, %p85_p1  ;;  %p4129_p5 = scmp.eq.s32.totalorder %s3542_s25, 0 }
  0x19   : > { %4159 = sst [smem:[#allocation19_spill]] %s3555_s29  ;;  %p2627_p6 = scmp.ge.s32.totalorder %s3413_s24, 1 }
  0x1a   : > { %p451_p7 = scmp.lt.s32.totalorder %s3413_s24, 3  ;;  %p3566_p8 = por %p4129_p5, %p91_p3 }
  0x1b   : > { %s3415_s18 = smov [#allocation3]   ;;  %p3029_p13 = scmp.lt.s32.totalorder %s3413_s24, 2 }
  0x1c   : > { %s4161_s0 = scalar_select %p3566_p8, 1, 0 }
  0x1d   : > { %p3571_p10 = pnand %p2627_p6, %p451_p7  ;;  %s463_s19 = sshll.u32 %s3415_s18, 4  ;;  %s464_s19 = int_to_ptr.vmem [resolvable:$true] %s463_s19 }
  0x1e   : > { %s498_s27 = sand.u32 1, %s3409_s23   ;;  %p3588_p0 = pnand %p3029_p13, %p3557_p4 }
  0x1f   : > { %s4162_s17 = scalar_select %p3571_p10, 1, 0 }
  0x20   : > { %p3007_p11 = pneg %p3571_p10  ;;  %s4165_s26 = sld [smem:[#allocation20_spill]] }
  0x21   : > { %s4164_s28 = scalar_select %p3588_p0, 1, 0 }
  0x22   : > { %p3579_p12 = pnand %p3007_p11, %p4129_p5 }
  0x24   : > { %s4163_s20 = scalar_select %p3579_p12, 1, 0 }
  0x25   : > { %p4138_p2 = pneg %p3579_p12 }
  0x26   : > { %s3165_s16 = scalar_lea.hbm %s4165_s26, 256 }
  0x27   : > { %p3166_p1 = scmp.ne.s32.totalorder %s4165_s26, %s3165_s16  ;;  %p3172_p4 = scmp.lt.u32.totalorder %s3165_s16, %s4165_s26 }
  0x29   : > { %p3168_p3 = pnand %p4138_p2, %p3166_p1 }
  0x2b   : > { %p3169_p6 = pneg %p3168_p3 }
  0x2d   : > { %p3174_p7 = pnand %p3172_p4, %p3169_p6 }
  0x2f   : > { %3177 = shalt.err (!%p3174_p7)
}
  0x30   : > { %s3178_s23 = scalar_lea.vmem %s464_s19, 256  ;;  %p3186_p5 = scmp.lt.s32.totalorder %s464_s19, %s464_s19 }
  0x31   : > { %p3179_p11 = scmp.ne.s32.totalorder %s464_s19, %s3178_s23  ;;  %p3187_p8 = scmp.lt.s32.totalorder %s3178_s23, %s3178_s23 }
  0x33   : > { %p3181_p13 = pnand %p3179_p11, %p4138_p2  ;;  %p3188_p10 = por %p3187_p8, %p3186_p5 }
  0x35   : > { %p3182_p9 = pneg %p3181_p13 }
  0x37   : > { %p3189_p0 = pnand %p3188_p10, %p3182_p9 }
  0x39   : > { %3192 = shalt.err (!%p3189_p0)
}
  0x3a   : > { %s4133_s14 = smov 128   ;;  %s4135_s15 = smov 8  }
  0x3b   : > { %3010 = dma.hbm_to_vmem [thread:$0]  (!%p3579_p12), %s4165_s26, 256, %s464_s19, [#allocation4], %s4133_s14, %s4133_s14, %s4135_s15  }
  0x3c   : > { %s3617_s21 = sshll.u32 %s498_s27, 5  ;;  %s3620_s23 = sshll.u32 %s3413_s24, 9 }
  0x3d   : > { %s4166_s2 = sld [smem:[#allocation22_spill]]  ;;  %s500_s12 = scalar_lea.vmem [#allocation8], %s3617_s21 }
  0x3e   : > { %s507_s11 = sshll.u32 %s500_s12, 4  ;;  %s4167_s4 = sld [smem:[#allocation23_spill]]  ;;  %s3629_s11 = int_to_ptr.vmem [resolvable:$true] %s507_s11 }
  0x3f   : > { %s4168_s29 = sand.u32 1, %s3413_s24   ;;  %p4169_p8 = scmp.ne.s32.totalorder %s4164_s28, 0 }
  0x40   : > { %s3639_s14 = scalar_lea.sflag [#allocation4], %s4168_s29 }
  0x41   : > { %p3645_p9 = pneg %p4169_p8 }
  0x43   : > { %s3626_s13 = scalar_lea.hbm %s4166_s2, %s3620_s23  ;;  %s3198_s19 = scalar_lea.hbm %s4166_s2, 1024 }
  0x44   : > { %s3635_s16 = scalar_lea.hbm %s4167_s4, %s3620_s23  ;;  %s3193_s18 = scalar_lea.hbm %s3626_s13, 512 }
  0x45   : > { %p3194_p5 = scmp.ne.s32.totalorder %s3626_s13, %s3193_s18  ;;  %p3199_p1 = scmp.lt.u32.totalorder %s3626_s13, %s4166_s2 }
  0x46   : > { %s4170_s30 = scalar_select %p3645_p9, 1, 0 }
  0x47   : > { %p3196_p10 = pnand %p3645_p9, %p3194_p5  ;;  %p3200_p3 = scmp.lt.u32.totalorder %s3198_s19, %s3193_s18 }
  0x48   : > { %p3202_p4 = scmp.lt.u32.totalorder %s3193_s18, %s3626_s13 }
  0x49   : > { %p3197_p0 = pneg %p3196_p10  ;;  %p3201_p6 = por %p3200_p3, %p3199_p1 }
  0x4b   : > { %p3203_p7 = por %p3202_p4, %p3201_p6 }
  0x4d   : > { %p3204_p11 = pnand %p3203_p7, %p3197_p0 }
  0x4f   : > { %3207 = shalt.err (!%p3204_p11)
}
  0x50   : > { %s3208_s24 = scalar_lea.vmem %s3629_s11, 512  ;;  %s3418_s15 = smov [#allocation8]  }
  0x51   : > { %p3209_p13 = scmp.ne.s32.totalorder %s3629_s11, %s3208_s24  ;;  %s3213_s29 = sshll.u32 %s3418_s15, 4  ;;  %s3214_s29 = int_to_ptr.vmem [resolvable:$false] %s3213_s29 }
  0x52   : > { %s3215_s26 = scalar_lea.vmem %s3214_s29, 1024  ;;  %p3216_p2 = scmp.lt.s32.totalorder %s3629_s11, %s3214_s29 }
  0x53   : > { %p3211_p5 = pnand %p3209_p13, %p3645_p9  ;;  %p3217_p12 = scmp.lt.s32.totalorder %s3215_s26, %s3208_s24 }
  0x55   : > { %p3212_p10 = pneg %p3211_p5  ;;  %p3218_p1 = por %p3217_p12, %p3216_p2 }
  0x57   : > { %p3219_p3 = pnand %p3218_p1, %p3212_p10 }
  0x59   : > { %3222 = shalt.err (!%p3219_p3)
}
  0x5a   : > { %s4171_s18 = smov 8   ;;  %s4172_s12 = smov 128  }
  0x5b   : > { %3017 = dma.hbm_to_vmem [thread:$0]  (!%p4169_p8), %s3626_s13, 512, %s3629_s11, %s3639_s14, %s4172_s12, %s4172_s12, %s4171_s18  }
  0x5c   : > { %s527_s19 = scalar_lea.vmem [#allocation9], %s3617_s21  ;;  %s3679_s29 = scalar_lea.hbm %s4114_s8, %s3620_s23 }
  0x5d   : > { %s534_s27 = sshll.u32 %s527_s19, 4  ;;  %s3223_s26 = scalar_lea.hbm %s3635_s16, 512  ;;  %s3673_s27 = int_to_ptr.vmem [resolvable:$true] %s534_s27 }
  0x5e   : > { %p3224_p12 = scmp.ne.s32.totalorder %s3635_s16, %s3223_s26  ;;  %s3228_s7 = scalar_lea.hbm %s4167_s4, 1024 }
  0x5f   : > { %p3229_p6 = scmp.lt.u32.totalorder %s3635_s16, %s4167_s4  ;;  %p3230_p4 = scmp.lt.u32.totalorder %s3228_s7, %s3223_s26 }
  0x60   : > { %p3226_p2 = pnand %p3224_p12, %p3645_p9  ;;  %p3232_p11 = scmp.lt.u32.totalorder %s3223_s26, %s3635_s16 }
  0x61   : > { %p3231_p7 = por %p3230_p4, %p3229_p6 }
  0x62   : > { %p3227_p0 = pneg %p3226_p2 }
  0x63   : > { %p3233_p13 = por %p3232_p11, %p3231_p7 }
  0x65   : > { %p3234_p5 = pnand %p3233_p13, %p3227_p0 }
  0x67   : > { %3237 = shalt.err (!%p3234_p5)
}
  0x68   : > { %s3238_s13 = scalar_lea.vmem %s3673_s27, 512  ;;  %s3419_s2 = smov [#allocation9]  }
  0x69   : > { %p3239_p10 = scmp.ne.s32.totalorder %s3673_s27, %s3238_s13  ;;  %s3243_s9 = sshll.u32 %s3419_s2, 4  ;;  %s3244_s9 = int_to_ptr.vmem [resolvable:$false] %s3243_s9 }
  0x6a   : > { %s3245_s6 = scalar_lea.vmem %s3244_s9, 1024  ;;  %p3246_p12 = scmp.lt.s32.totalorder %s3673_s27, %s3244_s9 }
  0x6b   : > { %p3241_p1 = pnand %p3239_p10, %p3645_p9  ;;  %p3247_p2 = scmp.lt.s32.totalorder %s3245_s6, %s3238_s13 }
  0x6d   : > { %p3242_p3 = pneg %p3241_p1  ;;  %p3248_p6 = por %p3247_p2, %p3246_p12 }
  0x6f   : > { %p3249_p4 = pnand %p3248_p6, %p3242_p3 }
  0x71   : > { %3252 = shalt.err (!%p3249_p4)
}
  0x72   : > { %3020 = dma.hbm_to_vmem [thread:$0]  (!%p4169_p8), %s3635_s16, 512, %s3673_s27, %s3639_s14, %s4172_s12, %s4172_s12, %s4171_s18  }
  0x73   : > { %s566_s7 = scalar_lea.vmem [#allocation10], %s3617_s21  ;;  %s3420_s24 = smov [#allocation6]  }
  0x74   : > { %s573_s19 = sshll.u32 %s566_s7, 4  ;;  %s3709_s15 = sshll.u32 %s3420_s24, 4  ;;  %s3707_s19 = int_to_ptr.vmem [resolvable:$true] %s573_s19  ;;  %s477_s15 = int_to_ptr.vmem [resolvable:$true] %s3709_s15 }
  0x75   : > { %s3253_s26 = scalar_lea.hbm %s3679_s29, 512  ;;  %s3258_s2 = scalar_lea.hbm %s4114_s8, 1024 }
  0x76   : > { %p3254_p0 = scmp.ne.s32.totalorder %s3679_s29, %s3253_s26  ;;  %p3259_p13 = scmp.lt.u32.totalorder %s3679_s29, %s4114_s8 }
  0x77   : > { %p3260_p5 = scmp.lt.u32.totalorder %s3258_s2, %s3253_s26  ;;  %p3262_p1 = scmp.lt.u32.totalorder %s3253_s26, %s3679_s29 }
  0x78   : > { %p3256_p7 = pnand %p3254_p0, %p3645_p9 }
  0x79   : > { %p3261_p10 = por %p3260_p5, %p3259_p13 }
  0x7a   : > { %p3257_p11 = pneg %p3256_p7 }
  0x7b   : > { %p3263_p3 = por %p3262_p1, %p3261_p10 }
  0x7d   : > { %p3264_p12 = pnand %p3263_p3, %p3257_p11 }
  0x7f   : > { %3267 = shalt.err (!%p3264_p12)
}
  0x80   : > { %s3268_s16 = scalar_lea.vmem %s3707_s19, 512  ;;  %s3421_s27 = smov [#allocation10]  }
  0x81   : > { %p3269_p2 = scmp.ne.s32.totalorder %s3707_s19, %s3268_s16  ;;  %s3273_s7 = sshll.u32 %s3421_s27, 4  ;;  %s3274_s7 = int_to_ptr.vmem [resolvable:$false] %s3273_s7 }
  0x82   : > { %s3275_s24 = scalar_lea.vmem %s3274_s7, 1024  ;;  %p3276_p0 = scmp.lt.s32.totalorder %s3707_s19, %s3274_s7 }
  0x83   : > { %p3271_p6 = pnand %p3269_p2, %p3645_p9  ;;  %p3277_p7 = scmp.lt.s32.totalorder %s3275_s24, %s3268_s16 }
  0x85   : > { %p3272_p4 = pneg %p3271_p6  ;;  %p3278_p13 = por %p3277_p7, %p3276_p0 }
  0x87   : > { %p3279_p5 = pnand %p3278_p13, %p3272_p4 }
  0x89   : > { %3282 = shalt.err (!%p3279_p5)
}
  0x8a   : > { %3023 = dma.hbm_to_vmem [thread:$0]  (!%p4169_p8), %s3679_s29, 512, %s3707_s19, %s3639_s14, %s4172_s12, %s4172_s12, %s4171_s18  }
  0x8b   : > { %s4173_s1 = sld [smem:[#allocation21_spill]]  ;;  %p4174_p10 = scmp.ne.s32.totalorder %s4163_s20, 0 }
  0x8d   : > { %p4175_p1 = pneg %p4174_p10 }
  0x91   : > { %s3283_s13 = scalar_lea.hbm %s4173_s1, 256 }
  0x92   : > { %p3284_p11 = scmp.ne.s32.totalorder %s4173_s1, %s3283_s13  ;;  %p3290_p2 = scmp.lt.u32.totalorder %s3283_s13, %s4173_s1 }
  0x94   : > { %p3286_p3 = pnand %p3284_p11, %p4175_p1 }
  0x96   : > { %p3287_p12 = pneg %p3286_p3 }
  0x98   : > { %p3292_p6 = pnand %p3290_p2, %p3287_p12 }
  0x9a   : > { %3295 = shalt.err (!%p3292_p6)
}
  0x9b   : > { %s3296_s29 = scalar_lea.vmem %s477_s15, 256  ;;  %p4176_p0 = pmov %p4175_p1 }
  0x9c   : > { %p3297_p4 = scmp.ne.s32.totalorder %s477_s15, %s3296_s29  ;;  %p3304_p5 = scmp.lt.s32.totalorder %s477_s15, %s477_s15 }
  0x9d   : > { %p3305_p8 = scmp.lt.s32.totalorder %s3296_s29, %s3296_s29 }
  0x9e   : > { %p3299_p7 = pnand %p3297_p4, %p4176_p0 }
  0x9f   : > { %p3306_p9 = por %p3305_p8, %p3304_p5 }
  0xa0   : > { %p3300_p13 = pneg %p3299_p7 }
  0xa2   : > { %p3307_p1 = pnand %p3306_p9, %p3300_p13 }
  0xa4   : > { %3310 = shalt.err (!%p3307_p1)
}
  0xa5   : > { %3013 = dma.hbm_to_vmem [thread:$0]  (!%p4174_p10), %s4173_s1, 256, %s477_s15, [#allocation7], %s4172_s12, %s4172_s12, %s4171_s18  }
  0xa6   : > { %s3764_s26 = scalar_lea.hbm %s4116_s10, %s3620_s23  ;;  %s593_s20 = scalar_lea.vmem [#allocation11], %s3617_s21 }
  0xa7   : > { %s600_s11 = sshll.u32 %s593_s20, 4  ;;  %s3311_s13 = scalar_lea.hbm %s3764_s26, 512  ;;  %s3767_s11 = int_to_ptr.vmem [resolvable:$true] %s600_s11 }
  0xa8   : > { %p3312_p8 = scmp.ne.s32.totalorder %s3764_s26, %s3311_s13  ;;  %p4177_p9 = scmp.ne.s32.totalorder %s4170_s30, 0 }
  0xa9   : > { %s3316_s9 = scalar_lea.hbm %s4116_s10, 1024  ;;  %p3317_p10 = scmp.lt.u32.totalorder %s3764_s26, %s4116_s10 }
  0xaa   : > { %p3314_p11 = pnand %p3312_p8, %p4177_p9  ;;  %p3318_p12 = scmp.lt.u32.totalorder %s3316_s9, %s3311_s13 }
  0xab   : > { %p3320_p6 = scmp.lt.u32.totalorder %s3311_s13, %s3764_s26 }
  0xac   : > { %p3315_p3 = pneg %p3314_p11  ;;  %p3319_p2 = por %p3318_p12, %p3317_p10 }
  0xae   : > { %p3321_p4 = por %p3320_p6, %p3319_p2 }
  0xb0   : > { %p3322_p0 = pnand %p3321_p4, %p3315_p3 }
  0xb2   : > { %3325 = shalt.err (!%p3322_p0)
}
  0xb3   : > { %s3326_s21 = scalar_lea.vmem %s3767_s11, 512  ;;  %s3422_s16 = smov [#allocation11]  }
  0xb4   : > { %p3327_p7 = scmp.ne.s32.totalorder %s3767_s11, %s3326_s21  ;;  %s3331_s29 = sshll.u32 %s3422_s16, 4  ;;  %s3332_s29 = int_to_ptr.vmem [resolvable:$false] %s3331_s29 }
  0xb5   : > { %s3333_s19 = scalar_lea.vmem %s3332_s29, 1024  ;;  %p3334_p1 = scmp.lt.s32.totalorder %s3767_s11, %s3332_s29 }
  0xb6   : > { %p3329_p13 = pnand %p3327_p7, %p4177_p9  ;;  %p3335_p8 = scmp.lt.s32.totalorder %s3333_s19, %s3326_s21 }
  0xb8   : > { %p3330_p5 = pneg %p3329_p13  ;;  %p3336_p11 = por %p3335_p8, %p3334_p1 }
  0xba   : > { %p3337_p10 = pnand %p3336_p11, %p3330_p5 }
  0xbc   : > { %3340 = shalt.err (!%p3337_p10)
}
  0xbd   : > { %p4178_p3 = scmp.ne.s32.totalorder %s4164_s28, 0  ;;  %p4179_p9 = scmp.ne.s32.totalorder %s4162_s17, 0 }
  0xbe   : > { %p4180_p12 = scmp.eq.s32.totalorder (!%p4179_p9), %s3542_s25, 0 }
  0xbf   : > { %3026 = dma.hbm_to_vmem [thread:$0]  (!%p4178_p3), %s3764_s26, 512, %s3767_s11, %s3639_s14, %s4172_s12, %s4172_s12, %s4171_s18  }
  0xc0   : > { %630 = sbr.rel (%p4179_p9) target bundleno = 3932 (0xf5c), region = 84 }
  0xc7   : > { %3384 = dma.done.wait (%p4180_p12), [#allocation4], 256   ;;  %p4181_p2 = pmov %p4180_p12 }
  0xc9   : > { %3386 = vsyncadd (%p4181_p2), [#allocation4], 4294967040  ;;  %p4182_p6 = pmov %p4181_p2 }
  0xca   : > { %p4183_p4 = pmov %p4181_p2 }
  0xcb   : > { %3388 = dma.done.wait (%p4182_p6), [#allocation7], 256  }
  0xcc   : > { %3390 = vsyncadd (%p4183_p4), [#allocation7], 4294967040  ;;  %s640_s28 = sand.u32 1, %s3542_s25   ;;  %s642_s14 = sand.u32 1, %s3405_s22  }
  0xcd   : > { %s2646_s30 = sshll.u32 %s642_s14, 5  ;;  %s641_s17 = scalar_lea.sflag [#allocation4], %s640_s28 }
  0xce   : > { %s644_s18 = scalar_lea.vmem [#allocation8], %s2646_s30  ;;  %p4184_p0 = scmp.ne.s32.totalorder %s4161_s0, 0 }
  0xd0   : > { %3392 = dma.done.wait (%p4184_p0), %s641_s17, 2048  }
  0xd1   : > { %3394 = vsyncadd (%p4184_p0), %s641_s17, 4294965248  ;;  %p754_p7 = scmp.lt.s32.totalorder %s3542_s25, 1  ;;  %s4185_s2 = sld [smem:[#allocation24_spill]] }
  0xd2   : > { %s4186_s23 = sld [smem:[#allocation25_spill]]  ;;  %s4187_s19 = sld [smem:[#allocation26_spill]] }
  0xd3   : > { %s3812_s12 = scalar_select %p754_p7, %s3542_s25, 1 }
  0xd4   : > { %s4188_s27 = sld [smem:[#allocation27_spill]]  ;;  %s4189_s26 = sld [smem:[#allocation28_spill]] }
  0xd5   : > { %s4190_s11 = sld [smem:[#allocation29_spill]]  ;;  %s3848_s9 = scalar_lea.vmem [#allocation10], %s2646_s30 }
  0xd6   : > { %s3850_s6 = scalar_lea.vmem [#allocation11], %s2646_s30  ;;  %p4191_p13 = scmp.ne.s32.totalorder %s3542_s25, 0 }
  0xd7   : > { %s762_s15 = scalar_lea.vmem %s4185_s2, %s3812_s12  ;;  %s3846_s2 = scalar_lea.vmem [#allocation9], %s2646_s30  ;;  %v782_v0 = vld [vmem:[#allocation3] sm:$0xff] (!%p4191_p13)  ;;  %vm784_vm0 = vcmask (!%p4191_p13), 261120   ;;  %v783_v1 = vld [vmem:[#allocation3 + $0x8] sm:$0x3] (!%p4191_p13)  ;;  %vm786_vm1 = vcmask (!%p4191_p13), 254976  }
  0xd8   : > { %s765_s21 = scalar_lea.vmem %s4186_s23, %s3812_s12  ;;  %s768_s28 = scalar_lea.vmem %s4187_s19, %s3812_s12  ;;  %785 = vst.msk [vmem:[#allocation2] sm:$0xff] (!%p4191_p13), %vm784_vm0, %v782_v0 }
  0xd9   : > { %781 = sbr.rel (%p4191_p13) target bundleno = 224 (0xe0), region = 112  ;;  %787 = vst.msk [vmem:[#allocation2 + $0x8] sm:$0x3] (!%p4191_p13), %vm786_vm1, %v783_v1 }
  0xda   : > { %s771_s7 = scalar_lea.vmem %s4188_s27, %s3812_s12  ;;  %s774_s0 = scalar_lea.vmem %s4189_s26, %s3812_s12 }
  0xdb   : > { %s777_s13 = scalar_lea.vmem %s4190_s11, %s3812_s12 }
  0xe0 PF: > { %v790_v2 = vld [vmem:[%s644_s18] sm:$0xff]  ;;  %v791_v3 = vld [vmem:[%s644_s18 + $0x8] sm:$0xff]  ;;  %v792_v4 = vld [vmem:[%s644_s18 + $0x10] sm:$0xff]  ;;  %vm801_vm2 = vcmask 261120   ;;  %s4192_s30 = scalar_lea.vmem %s4109_s3, %s3812_s12  ;;  %vm897_vm3 = vcmask 64512   ;;  %vm987_vm5 = vcmask 74752   ;;  %s4197_s1 = scalar_lea.vmem %s4111_s5, %s3812_s12 }
  0xe1   : > { %v2901_v5 = vpack.c.bf16 %v791_v3, %v790_v2  ;;  %v793_v6 = vld [vmem:[%s644_s18 + $0x18] sm:$0xff]  ;;  %v3854_v7 = vld [vmem:[#allocation2] sm:$0xff]  ;;  %s3423_s18 = smov 96   ;;  %vm3876_vm4 = vmpackc.low %vm897_vm3, %vm897_vm3  ;;  %vm983_vm6 = vcmask 80896   ;;  %s3424_s24 = smov 64   ;;  %vm1018_vm7 = vcmask 1041408  }
  0xe2   : > { %v2905_v8 = vpack.c.bf16 %v793_v6, %v792_v4  ;;  %2789 = vmatprep.mubr.msk.f32.mxu0 %vm801_vm2, %v3854_v7  ;;  %v3858_v9 = vld [vmem:[#allocation2 + $0x8] sm:$0x3]  ;;  %v2651_v10 = vld [vmem:[%s4192_s30] ss:$0 sm:$0xff]  ;;  %s3425_s20 = smov 88   ;;  %s3426_s23 = smov 120  }
  0xe3   : > { %2902 = vmatprep.subr.bf16.mxu0 %v2901_v5  ;;  %v3888_v23 = vld [vmem:[#allocation6 + $0x8] sm:$0x3]  ;;  %v3890_v24 = vld [vmem:[#allocation6] sm:$0xff]  ;;  %vm3427_vm8 = vmmov 1   ;;  %s3428_s16 = smov 80   ;;  %s3429_s29 = smov 112  }
  0xe4   : > { %2904 = vmatpush3.bf16.msra.mxu0 %v2901_v5  ;;  %vm3899_vm9 = vmpackc.low %vm1018_vm7, %vm3427_vm8  ;;  %s3430_s19 = smov 56   ;;  %s3431_s14 = smov 72   ;;  %v2690_v40 = vld [vmem:[%s4197_s1] ss:$0 sm:$0xff]  ;;  %vm2043_vm10 = vcmask 254976  }
  0xe5   : > { %2906 = vmatprep.subr.bf16.mxu0 %v2905_v8  ;;  %s3432_s17 = smov 104   ;;  %s3433_s27 = smov 48  }
  0xe6   : > { %s3434_s26 = smov 40   ;;  %p2701_p5 = scmp.ne.s32.totalorder %s3542_s25, 1 }
  0xe7   : > { %s4204_s11 = sld [smem:[#allocation30_spill]] (!%p2701_p5) }
  0xe8   : > { %2908 = vmatpush3.bf16.msra.mxu0 %v2905_v8 }
  0xeb   : > { %2790 = vmatmul.mubr.msk.f32.vlgmr.msra.gmra.mrb[0].mxu0 %vm801_vm2, %v3858_v9 }
 0x1be   : > { %v2791_v11 = vpop.f32.mrb[0].mxu0 }
 0x1bf   : > { %v880_v12 = vadd.f32 %v2791_v11, %v2651_v10  ;;  %v874_v13 = vpop.f32.mrb[1].mxu0 }
 0x1c0   : > { %v875_v14 = vadd.f32 %v2651_v10, %v874_v13 }
 0x1c1   : > { %v3884_v22 = vmul.f32 0.35355338, %v880_v12 }
 0x1c2   : > { %v3867_v15 = vpack.i.bf16 %v880_v12, %v875_v14  ;;  %v3869_v16 = vmul.f32 0.35355338, %v875_v14 }
 0x1c4   : > { %3086 = vrot.lane.b32.xlu0 %v3867_v15, %s3423_s18  ;;  %2796 = vmatprep.mubr.msk.f32.mxu1 %vm897_vm3, %v3869_v16 }
 0x236   : > { %v3087_v17 = vpop.permute.xlu0 %3086 }
 0x237   : > { %v3089_v18 = vunpack.i.h.bf16 %v3087_v17  ;;  %v3088_v19 = vunpack.i.l.bf16 %v3087_v17 }
 0x239   : > { %v2909_v21 = vpack.c.bf16 %v3089_v18, %v3088_v19 }
 0x23b   : > { %2911 = vmatprep.subr.msk.bf16.mxu1 %vm3876_vm4, %v2909_v21 }
 0x23c   : > { %2914 = vmatpush3.bf16.xpose.msk.msra.mxu1 %vm3876_vm4, %v2909_v21 }
 0x243   : > { %2797 = vmatmul.mubr.msk.f32.vlgmr.msra.gmra.mrb[0].mxu1 %vm897_vm3, %v3884_v22 }
 0x316   : > { %v2798_v25 = vpop.f32.mrb[0].mxu1 }
 0x317   : > { %v980_v26 = vadd.f32 %v2798_v25, %v3888_v23  ;;  %v974_v27 = vpop.f32.mrb[1].mxu1 }
 0x318   : > { %v975_v28 = vadd.f32 %v974_v27, %v3890_v24 }
 0x319   : > { %v988_v29 = vsel %vm987_vm5, %v980_v26, -inf }
 0x31a   : > { %989 = vmax.xlane.f32.xlu1 %v988_v29  ;;  %v984_v30 = vsel %vm983_vm6, %v975_v28, -inf }
 0x31b   : > { %985 = vmax.xlane.f32.xlu0 %v984_v30 }
 0x32b   : > { %3091 = vrot.lane.b32.xlu1 %v3867_v15, %s3424_s24  ;;  %s4205_s24 = sld [smem:[#allocation31_spill]] (!%p2701_p5) }
 0x32f   : > { %3096 = vrot.lane.b32.xlu1 %v3867_v15, %s3425_s20 }
 0x331   : > { %1098 = vrot.lane.b32.xlu0 %v3884_v22, %s3426_s23 }
 0x3a7   : > { %v990_v31 = vpop.xlane.xlu1 %989 }
 0x3a8   : > { %v992_v32 = vsub.f32 %v980_v26, %v990_v31  ;;  %v986_v33 = vpop.xlane.xlu0 %985 }
 0x3a9   : > { %v991_v34 = vsub.f32 %v975_v28, %v986_v33 }
 0x3aa   : > { %v995_v35 = vmul.f32 1.442695, %v992_v32 }
 0x3ab   : > { %v993_v36 = vmul.f32 1.442695, %v991_v34  ;;  %v3092_v37 = vpop.permute.xlu1 %3091 }
 0x3ac   : > { %3125 = vpow2.f32 %v995_v35  ;;  %v3094_v38 = vunpack.i.h.bf16 %v3092_v37  ;;  %v3093_v39 = vunpack.i.l.bf16 %v3092_v37  ;;  %v1099_v61 = vpop.permute.xlu0 %1098 }
 0x3ad   : > { %3127 = vpow2.f32 %v993_v36 }
 0x3ae   : > { %v2915_v41 = vpack.c.bf16 %v3094_v38, %v3093_v39 }
 0x3af   : > { %v3097_v42 = vpop.permute.xlu1 %3096 }
 0x3b0   : > { %v3099_v43 = vunpack.i.h.bf16 %v3097_v42  ;;  %v3098_v44 = vunpack.i.l.bf16 %v3097_v42  ;;  %2917 = vmatprep.subr.msk.bf16.mxu1 %vm3899_vm9, %v2915_v41 }
 0x3b1   : > { %2920 = vmatpush3.bf16.msk.msra.mxu1 %vm3899_vm9, %v2915_v41 }
 0x3b2   : > { %v2921_v45 = vpack.c.bf16 %v3099_v43, %v3098_v44 }
 0x3b4   : > { %2923 = vmatprep.subr.msk.bf16.mxu1 %vm3876_vm4, %v2921_v45 }
 0x3b6   : > { %v3126_v46 = vpop.eup %3125 }
 0x3b7   : > { %v1000_v47 = vsel %vm987_vm5, %v3126_v46, 0.0  ;;  %v3128_v48 = vpop.eup %3127 }
 0x3b8   : > { %1001 = vadd.xlane.f32.xlu1 %v1000_v47  ;;  %v997_v49 = vsel %vm983_vm6, %v3128_v48, 0.0 }
 0x3bc   : > { %998 = vadd.xlane.f32.xlu1 %v997_v49 }
 0x3cd   : > { %1096 = vrot.lane.b32.xlu1 %v3869_v16, %s3426_s23 }
 0x3d1   : > { %3101 = vrot.lane.b32.xlu1 %v3867_v15, %s3428_s16 }
 0x3d5   : > { %1459 = vrot.lane.b32.xlu1 %v3869_v16, %s3429_s29 }
 0x3d9   : > { %1461 = vrot.lane.b32.xlu1 %v3884_v22, %s3429_s29 }
 0x445   : > { %v1002_v50 = vpop.xlane.xlu1 %1001 }
 0x446   : > { %3129 = vrcp.f32 %v1002_v50 }
 0x449   : > { %v999_v51 = vpop.xlane.xlu1 %998 }
 0x44a   : > { %3131 = vrcp.f32 %v999_v51 }
 0x44d   : > { %v1097_v52 = vpop.permute.xlu1 %1096 }
 0x450   : > { %v3130_v54 = vpop.eup %3129 }
 0x451   : > { %v3102_v53 = vpop.permute.xlu1 %3101  ;;  %v1006_v59 = vmul.f32 %v3130_v54, %v3126_v46 }
 0x452   : > { %v3104_v56 = vunpack.i.h.bf16 %v3102_v53  ;;  %v3103_v57 = vunpack.i.l.bf16 %v3102_v53 }
 0x454   : > { %v3132_v55 = vpop.eup %3131  ;;  %v2933_v60 = vpack.c.bf16 %v3104_v56, %v3103_v57  ;;  %v887_v56 = vld [vmem:[%s3846_s2] sm:$0xff] }
 0x455   : > { %v1005_v58 = vmul.f32 %v3132_v55, %v3128_v48  ;;  %v1460_v62 = vpop.permute.xlu1 %1459  ;;  %v888_v55 = vld [vmem:[%s3846_s2 + $0x8] sm:$0xff] }
 0x457   : > { %2803 = vmatprep.mubr.msk.f32.mxu1 %vm983_vm6, %v1005_v58 }
 0x458   : > { %2804 = vmatmul.mubr.msk.f32.vlgmr.msra.gmra.mrb[2].mxu1 %vm983_vm6, %v1006_v59 }
 0x459   : > { %2926 = vmatpush3.bf16.xpose.msk.msra.mxu1 %vm3876_vm4, %v2921_v45  ;;  %2810 = vmatprep.mubr.msk.f32.mxu1 %vm897_vm3, %v1097_v52  ;;  %v1462_v63 = vpop.permute.xlu1 %1461 }
 0x45a   : > { %2935 = vmatprep.subr.msk.bf16.mxu1 %vm3876_vm4, %v2933_v60 }
 0x460   : > { %2811 = vmatmul.mubr.msk.f32.vlgmr.msra.gmra.mrb[4].mxu1 %vm897_vm3, %v1099_v61 }
 0x461   : > { %2938 = vmatpush3.bf16.xpose.msk.msra.mxu1 %vm3876_vm4, %v2933_v60  ;;  %2834 = vmatprep.mubr.msk.f32.mxu1 %vm897_vm3, %v1460_v62 }
 0x468   : > { %2835 = vmatmul.mubr.msk.f32.vlgmr.msra.gmra.mrb[6].mxu1 %vm897_vm3, %v1462_v63 }
 0x52b   : > { %v3927_v0 = vpop.f32.mrb[2].mxu1 }
 0x52c   : > { %v3929_v1 = vpop.f32.mrb[3].mxu1 }
 0x533   : > { %v2812_v2 = vpop.f32.mrb[4].mxu1 }
 0x534   : > { %v1184_v3 = vadd.f32 %v2812_v2, %v3888_v23  ;;  %v1178_v4 = vpop.f32.mrb[5].mxu1 }
 0x535   : > { %v1179_v5 = vadd.f32 %v1178_v4, %v3890_v24 }
 0x536   : > { %v1190_v6 = vsel %vm987_vm5, %v1184_v3, -inf }
 0x537   : > { %1191 = vmax.xlane.f32.xlu0 %v1190_v6  ;;  %v1187_v8 = vsel %vm983_vm6, %v1179_v5, -inf }
 0x538   : > { %1188 = vmax.xlane.f32.xlu1 %v1187_v8 }
 0x53b   : > { %v2836_v10 = vpop.f32.mrb[6].mxu1 }
 0x53c   : > { %v1541_v11 = vpop.f32.mrb[7].mxu1  ;;  %v1547_v30 = vadd.f32 %v2836_v10, %v3888_v23 }
 0x53d   : > { %v1542_v28 = vadd.f32 %v1541_v11, %v3890_v24 }
 0x53e   : > { %v1553_v31 = vsel %vm987_vm5, %v1547_v30, -inf }
 0x53f   : > { %v1550_v29 = vsel %vm983_vm6, %v1542_v28, -inf }
 0x5c4   : > { %v1192_v12 = vpop.xlane.xlu0 %1191 }
 0x5c5   : > { %v1194_v13 = vsub.f32 %v1184_v3, %v1192_v12  ;;  %v1189_v14 = vpop.xlane.xlu1 %1188 }
 0x5c6   : > { %v1193_v17 = vsub.f32 %v1179_v5, %v1189_v14  ;;  %v889_v14 = vld [vmem:[%s3846_s2 + $0x10] sm:$0xff] }
 0x5c7   : > { %v1197_v18 = vmul.f32 1.442695, %v1194_v13 }
 0x5c8   : > { %v1195_v19 = vmul.f32 1.442695, %v1193_v17 }
 0x5c9   : > { %3133 = vpow2.f32 %v1197_v18 }
 0x5ca   : > { %3135 = vpow2.f32 %v1195_v19 }
 0x5d3   : > { %v3134_v21 = vpop.eup %3133 }
 0x5d4   : > { %v3136_v25 = vpop.eup %3135  ;;  %v1202_v26 = vsel %vm987_vm5, %v3134_v21, 0.0 }
 0x5d5   : > { %1203 = vadd.xlane.f32.xlu0 %v1202_v26  ;;  %v1199_v27 = vsel %vm983_vm6, %v3136_v25, 0.0 }
 0x5d6   : > { %1200 = vadd.xlane.f32.xlu1 %v1199_v27 }
 0x5e7   : > { %3106 = vrot.lane.b32.xlu1 %v3867_v15, %s3430_s19 }
 0x5eb   : > { %3111 = vrot.lane.b32.xlu0 %v3867_v15, %s3431_s14  ;;  %1743 = vrot.lane.b32.xlu1 %v3869_v16, %s3432_s17 }
 0x5ef   : > { %1745 = vrot.lane.b32.xlu1 %v3884_v22, %s3432_s17 }
 0x60a   : > { %1551 = vmax.xlane.f32.xlu0 %v1550_v29 }
 0x613   : > { %1554 = vmax.xlane.f32.xlu1 %v1553_v31 }
 0x624   : > { %3116 = vrot.lane.b32.xlu1 %v3867_v15, %s3433_s27 }
 0x628   : > { %3121 = vrot.lane.b32.xlu1 %v3867_v15, %s3434_s26 }
 0x662   : > { %v1204_v32 = vpop.xlane.xlu0 %1203 }
 0x663   : > { %3137 = vrcp.f32 %v1204_v32  ;;  %v1201_v16 = vpop.xlane.xlu1 %1200 }
 0x664   : > { %3139 = vrcp.f32 %v1201_v16 }
 0x666   : > { %v3112_v22 = vpop.permute.xlu0 %3111 }
 0x667   : > { %v3114_v33 = vunpack.i.h.bf16 %v3112_v22  ;;  %v3113_v34 = vunpack.i.l.bf16 %v3112_v22  ;;  %v3107_v35 = vpop.permute.xlu1 %3106  ;;  %v890_v22 = vld [vmem:[%s3846_s2 + $0x18] sm:$0xff] }
 0x668   : > { %v3109_v36 = vunpack.i.h.bf16 %v3107_v35  ;;  %v3108_v37 = vunpack.i.l.bf16 %v3107_v35 }
 0x669   : > { %v2945_v38 = vpack.c.bf16 %v3114_v33, %v3113_v34 }
 0x66a   : > { %v2927_v39 = vpack.c.bf16 %v3109_v36, %v3108_v37 }
 0x66b   : > { %2947 = vmatprep.subr.msk.bf16.mxu1 %vm3876_vm4, %v2945_v38  ;;  %v1744_v41 = vpop.permute.xlu1 %1743 }
 0x66c   : > { %2929 = vmatprep.subr.msk.bf16.mxu0 %vm3899_vm9, %v2927_v39  ;;  %2950 = vmatpush3.bf16.xpose.msk.msra.mxu1 %vm3876_vm4, %v2945_v38 }
 0x66d   : > { %v3138_v15 = vpop.eup %3137  ;;  %2853 = vmatprep.mubr.msk.f32.mxu1 %vm897_vm3, %v1744_v41  ;;  %2932 = vmatpush3.bf16.msk.msra.mxu0 %vm3899_vm9, %v2927_v39 }
 0x66e   : > { %v3140_v42 = vpop.eup %3139  ;;  %v1208_v44 = vmul.f32 %v3138_v15, %v3134_v21  ;;  %2820 = vmatprep.subr.mxu0 %v888_v55 }
 0x66f   : > { %v1207_v43 = vmul.f32 %v3140_v42, %v3136_v25  ;;  %v1746_v45 = vpop.permute.xlu1 %1745 }
 0x671   : > { %2817 = vmatprep.mubr.msk.f32.mxu0 %vm983_vm6, %v1207_v43 }
 0x672   : > { %2818 = vmatmul.mubr.msk.f32.vlgmr.msra.gmra.mrb[2].mxu0 %vm983_vm6, %v1208_v44 }
 0x673   : > { %2854 = vmatmul.mubr.msk.f32.vlgmr.msra.gmra.mrb[8].mxu1 %vm897_vm3, %v1746_v45  ;;  %2821 = vmatpush3.msra.mxu0 %v888_v55 }
 0x674   : > { %2825 = vmatprep.subr.mxu0 %v887_v56 }
 0x697   : > { %v1552_v46 = vpop.xlane.xlu0 %1551 }
 0x698   : > { %v1556_v20 = vsub.f32 %v1542_v28, %v1552_v46 }
 0x69a   : > { %v1558_v47 = vmul.f32 1.442695, %v1556_v20 }
 0x69c   : > { %3141 = vpow2.f32 %v1558_v47 }
 0x6a0   : > { %v1555_v48 = vpop.xlane.xlu1 %1554 }
 0x6a1   : > { %v1557_v49 = vsub.f32 %v1547_v30, %v1555_v48 }
 0x6a3   : > { %v1560_v50 = vmul.f32 1.442695, %v1557_v49 }
 0x6a4   : > { %v3117_v58 = vpop.permute.xlu1 %3116 }
 0x6a5   : > { %3143 = vpow2.f32 %v1560_v50  ;;  %v3119_v60 = vunpack.i.h.bf16 %v3117_v58  ;;  %v3118_v61 = vunpack.i.l.bf16 %v3117_v58 }
 0x6a6   : > { %v3142_v51 = vpop.eup %3141 }
 0x6a7   : > { %v1562_v52 = vsel %vm983_vm6, %v3142_v51, 0.0  ;;  %v2939_v4 = vpack.c.bf16 %v3119_v60, %v3118_v61  ;;  %v2087_v60 = vld [vmem:[%s3848_s9 + $0x18] sm:$0xff] }
 0x6a8   : > { %1563 = vadd.xlane.f32.xlu0 %v1562_v52  ;;  %v3122_v11 = vpop.permute.xlu1 %3121 }
 0x6a9   : > { %v3124_v17 = vunpack.i.h.bf16 %v3122_v11  ;;  %v3123_v18 = vunpack.i.l.bf16 %v3122_v11 }
 0x6af   : > { %v3144_v53 = vpop.eup %3143 }
 0x6b0   : > { %v1565_v54 = vsel %vm987_vm5, %v3144_v53, 0.0 }
 0x6b1   : > { %1566 = vadd.xlane.f32.xlu0 %v1565_v54 }
 0x735   : > { %v1564_v57 = vpop.xlane.xlu0 %1563 }
 0x736   : > { %3145 = vrcp.f32 %v1564_v57  ;;  %v2085_v57 = vld [vmem:[%s3848_s9 + $0x8] sm:$0xff] }
 0x73e   : > { %v1567_v59 = vpop.xlane.xlu0 %1566 }
 0x73f   : > { %3147 = vrcp.f32 %v1567_v59  ;;  %v2086_v59 = vld [vmem:[%s3848_s9 + $0x10] sm:$0xff] }
 0x740   : > { %v3146_v10 = vpop.eup %3145  ;;  %v2961_v61 = vpack.c.bf16 %v2087_v60, %v2086_v59 }
 0x745   : > { %v2819_v62 = vpop.f32.mrb[2].mxu0 }
 0x746   : > { %v1288_v63 = vpop.f32.mrb[3].mxu0  ;;  %v2855_v2 = vpop.f32.mrb[8].mxu1 }
 0x747   : > { %2822 = vmatprep.mubr.msk.f32.mxu0 %vm897_vm3, %v1288_v63  ;;  %v1825_v3 = vpop.f32.mrb[9].mxu1  ;;  %v1831_v6 = vadd.f32 %v2855_v2, %v3888_v23  ;;  %v2179_v63 = vld [vmem:[%s3850_s6 + $0x8] sm:$0xff] }
 0x748   : > { %v1826_v5 = vadd.f32 %v1825_v3, %v3890_v24  ;;  %2823 = vmatmul.mubr.msk.f32.vlgmr.msra.gmra.mrb[4].mxu0 %vm897_vm3, %v2819_v62  ;;  %v1570_v24 = vmul.f32 %v3146_v10, %v3142_v51  ;;  %v2178_v62 = vld [vmem:[%s3850_s6] sm:$0xff] }
 0x749   : > { %2826 = vmatpush3.msra.mxu0 %v887_v56  ;;  %2827 = vmatprep.mubr.msk.f32.mxu0 %vm897_vm3, %v3929_v1  ;;  %v1837_v12 = vsel %vm987_vm5, %v1831_v6, -inf  ;;  %v3148_v13 = vpop.eup %3147  ;;  %v2951_v1 = vpack.c.bf16 %v3124_v17, %v3123_v18  ;;  %v2084_v56 = vld [vmem:[%s3848_s9] sm:$0xff]  ;;  %v2965_v2 = vpack.c.bf16 %v2179_v63, %v2178_v62  ;;  %v2322_v62 = vld [vmem:[%s4204_s11] sm:$0xff] (!%p2701_p5)  ;;  %v2323_v63 = vld [vmem:[%s4204_s11 + $0x8] sm:$0xff] (!%p2701_p5) }
 0x74a   : > { %2941 = vmatprep.subr.msk.bf16.mxu0 %vm3899_vm9, %v2939_v4  ;;  %v1834_v8 = vsel %vm983_vm6, %v1826_v5, -inf  ;;  %v1571_v23 = vmul.f32 %v3148_v13, %v3144_v53  ;;  %v2957_v58 = vpack.c.bf16 %v2085_v57, %v2084_v56 }
 0x74b   : > { %1835 = vmax.xlane.f32.xlu0 %v1834_v8 }
 0x74c   : > { %2958 = vmatprep.subr.bf16.mxu1 %v2957_v58 }
 0x74d   : > { %2960 = vmatpush3.bf16.msra.mxu1 %v2957_v58 }
 0x74e   : > { %2962 = vmatprep.subr.bf16.mxu1 %v2961_v61 }
 0x74f   : > { %1838 = vmax.xlane.f32.xlu0 %v1837_v12  ;;  %v2691_v12 = vld [vmem:[%s762_s15] ss:$0 sm:$0xff] }
 0x750   : > { %2828 = vmatmul.mubr.msk.f32.vlgmr.msra.gmra.mrb[4].mxu0 %vm897_vm3, %v3927_v0 }
 0x751   : > { %2944 = vmatpush3.bf16.msk.msra.mxu0 %vm3899_vm9, %v2939_v4  ;;  %2841 = vmatprep.mubr.msk.f32.mxu0 %vm983_vm6, %v1570_v24  ;;  %v2692_v24 = vld [vmem:[%s765_s21] ss:$0 sm:$0xff] }
 0x752   : > { %2844 = vmatprep.subr.mxu0 %v889_v14  ;;  %2964 = vmatpush3.bf16.msra.mxu1 %v2961_v61 }
 0x754   : > { %2842 = vmatmul.mubr.msk.f32.vlgmr.msra.gmra.mrb[6].mxu0 %vm983_vm6, %v1571_v23 }
 0x755   : > { %2845 = vmatpush3.msra.mxu0 %v889_v14 }
 0x756   : > { %2953 = vmatprep.subr.msk.bf16.mxu0 %vm3899_vm9, %v2951_v1 }
 0x7d8   : > { %v1836_v19 = vpop.xlane.xlu0 %1835 }
 0x7d9   : > { %v1840_v21 = vsub.f32 %v1826_v5, %v1836_v19 }
 0x7db   : > { %v1842_v25 = vmul.f32 1.442695, %v1840_v21  ;;  %v2180_v21 = vld [vmem:[%s3850_s6 + $0x10] sm:$0xff] }
 0x7dc   : > { %v1839_v26 = vpop.xlane.xlu0 %1838 }
 0x7dd   : > { %3149 = vpow2.f32 %v1842_v25  ;;  %v1841_v0 = vsub.f32 %v1831_v6, %v1839_v26  ;;  %v2181_v25 = vld [vmem:[%s3850_s6 + $0x18] sm:$0xff] }
 0x7de   : > { %v2969_v26 = vpack.c.bf16 %v2181_v25, %v2180_v21 }
 0x7df   : > { %v1844_v27 = vmul.f32 1.442695, %v1841_v0  ;;  %v2693_v0 = vld [vmem:[%s768_s28] ss:$0 sm:$0xff] }
 0x7e1   : > { %3151 = vpow2.f32 %v1844_v27 }
 0x7e7   : > { %v3150_v28 = vpop.eup %3149 }
 0x7e8   : > { %v1846_v29 = vsel %vm983_vm6, %v3150_v28, 0.0 }
 0x7e9   : > { %1847 = vadd.xlane.f32.xlu0 %v1846_v29 }
 0x7eb   : > { %v3152_v30 = vpop.eup %3151 }
 0x7ec   : > { %v1849_v31 = vsel %vm987_vm5, %v3152_v30, 0.0 }
 0x7ed   : > { %1850 = vadd.xlane.f32.xlu0 %v1849_v31 }
 0x827   : > { %v2843_v32 = vpop.f32.mrb[6].mxu0 }
 0x828   : > { %v1651_v16 = vpop.f32.mrb[7].mxu0 }
 0x829   : > { %2846 = vmatprep.mubr.msk.f32.mxu0 %vm897_vm3, %v1651_v16  ;;  %v2696_v16 = vld [vmem:[%s771_s7] ss:$0 sm:$0xff] }
 0x82a   : > { %2847 = vmatmul.mubr.msk.f32.vlgmr.msra.gmra.mrb[4].mxu0 %vm897_vm3, %v2843_v32 }
 0x82b   : > { %2956 = vmatpush3.bf16.msk.msra.mxu0 %vm3899_vm9, %v2951_v1 }
 0x82c   : > { %2863 = vmatprep.subr.mxu0 %v890_v22 }
 0x876   : > { %v1848_v33 = vpop.xlane.xlu0 %1847 }
 0x877   : > { %3153 = vrcp.f32 %v1848_v33 }
 0x87a   : > { %v1851_v34 = vpop.xlane.xlu0 %1850 }
 0x87b   : > { %3155 = vrcp.f32 %v1851_v34 }
 0x881   : > { %v3154_v35 = vpop.eup %3153 }
 0x882   : > { %v1854_v36 = vmul.f32 %v3154_v35, %v3150_v28 }
 0x884   : > { %2860 = vmatprep.mubr.msk.f32.mxu0 %vm983_vm6, %v1854_v36 }
 0x885   : > { %v3156_v37 = vpop.eup %3155 }
 0x886   : > { %v1855_v38 = vmul.f32 %v3156_v37, %v3152_v30 }
 0x888   : > { %2861 = vmatmul.mubr.msk.f32.vlgmr.msra.gmra.mrb[8].mxu0 %vm983_vm6, %v1855_v38 }
 0x889   : > { %2864 = vmatpush3.msra.mxu0 %v890_v22 }
 0x88a   : > { %2966 = vmatprep.subr.bf16.mxu0 %v2965_v2 }
 0x95b   : > { %v2862_v39 = vpop.f32.mrb[8].mxu0 }
 0x95c   : > { %v1935_v41 = vpop.f32.mrb[9].mxu0 }
 0x95d   : > { %2865 = vmatprep.mubr.msk.f32.mxu0 %vm897_vm3, %v1935_v41 }
 0x95e   : > { %2866 = vmatmul.mubr.msk.f32.vlgmr.msra.gmra.mrb[4].mxu0 %vm897_vm3, %v2862_v39 }
 0x95f   : > { %2968 = vmatpush3.bf16.msra.mxu0 %v2965_v2  ;;  %v2324_v2 = vld [vmem:[%s4204_s11 + $0x10] sm:$0xff] (!%p2701_p5) }
 0x960   : > { %2970 = vmatprep.subr.bf16.mxu0 %v2969_v26 }
 0x963   : > { %2972 = vmatpush3.bf16.msra.mxu0 %v2969_v26 }
 0xa31   : > { %v2867_v15 = vpop.f32.mrb[4].mxu0 }
 0xa32   : > { %v2035_v42 = vadd.f32 %v2867_v15, %v2690_v40  ;;  %v2016_v43 = vpop.f32.mrb[5].mxu0 }
 0xa33   : > { %v2034_v44 = vadd.f32 %v2690_v40, %v2016_v43 }
 0xa34   : > { %v2037_v45 = vadd.f32 %v2035_v42, %v3858_v9 }
 0xa35   : > { %v2036_v46 = vadd.f32 %v2034_v44, %v3854_v7 }
 0xa36   : > { %v2044_v20 = vsel %vm2043_vm10, %v2037_v45, 0.0 }
 0xa37   : > { %2045 = vadd.xlane.f32.xlu1 %v2044_v20  ;;  %v2040_v47 = vsel %vm801_vm2, %v2036_v46, 0.0 }
 0xa38   : > { %2041 = vadd.xlane.f32.xlu0 %v2040_v47 }
 0xac4   : > { %v2046_v48 = vpop.xlane.xlu1 %2045 }
 0xac5   : > { %v2049_v49 = vmul.f32 0.03125, %v2046_v48  ;;  %v2042_v50 = vpop.xlane.xlu0 %2041 }
 0xac6   : > { %v2048_v51 = vmul.f32 0.03125, %v2042_v50 }
 0xac7   : > { %v2051_v52 = vsub.f32 %v2037_v45, %v2049_v49 }
 0xac8   : > { %v2050_v53 = vsub.f32 %v2036_v46, %v2048_v51 }
 0xac9   : > { %v2053_v9 = vmul.f32 %v2051_v52, %v2051_v52 }
 0xaca   : > { %v2052_v54 = vmul.f32 %v2050_v53, %v2050_v53 }
 0xacb   : > { %v2057_v55 = vsel %vm2043_vm10, %v2053_v9, 0.0 }
 0xacc   : > { %v2054_v7 = vsel %vm801_vm2, %v2052_v54, 0.0 }
 0xacd   : > { %2055 = vadd.xlane.f32.xlu0 %v2054_v7  ;;  %v2699_v7 = vld [vmem:[%s774_s0] ss:$0 sm:$0xff] }
 0xad1   : > { %2058 = vadd.xlane.f32.xlu0 %v2057_v55  ;;  %v2700_v55 = vld [vmem:[%s777_s13] ss:$0 sm:$0xff] }
 0xb5a   : > { %v2056_v3 = vpop.xlane.xlu0 %2055 }
 0xb5b   : > { %v2060_v4 = vmul.f32 0.03125, %v2056_v3  ;;  %v2973_v3 = vpack.c.bf16 (!%p2701_p5), %v2323_v63, %v2322_v62 }
 0xb5d   : > { %v2062_v5 = vadd.f32 1e-06, %v2060_v4  ;;  %v2325_v4 = vld [vmem:[%s4204_s11 + $0x18] sm:$0xff] (!%p2701_p5)  ;;  %2974 = vmatprep.subr.bf16.mxu0 (!%p2701_p5), %v2973_v3 }
 0xb5e   : > { %v2059_v6 = vpop.xlane.xlu0 %2058 }
 0xb5f   : > { %3157 = vrsqrt.f32 %v2062_v5  ;;  %v2061_v8 = vmul.f32 0.03125, %v2059_v6  ;;  %v2977_v5 = vpack.c.bf16 (!%p2701_p5), %v2325_v4, %v2324_v2  ;;  %v2702_v6 = vld [vmem:[%s4205_s24] ss:$0 sm:$0xff] (!%p2701_p5) }
 0xb61   : > { %v2063_v10 = vadd.f32 1e-06, %v2061_v8 }
 0xb63   : > { %3159 = vrsqrt.f32 %v2063_v10 }
 0xb69   : > { %v3158_v11 = vpop.eup %3157 }
 0xb6a   : > { %v2066_v13 = vmul.f32 %v3158_v11, %v2050_v53 }
 0xb6c   : > { %v2074_v14 = vmul.f32 %v2691_v12, %v2066_v13 }
 0xb6d   : > { %v3160_v17 = vpop.eup %3159 }
 0xb6e   : > { %v2067_v18 = vmul.f32 %v3160_v17, %v2051_v52  ;;  %v2082_v23 = vadd.f32 %v2692_v24, %v2074_v14 }
 0xb70   : > { %v2075_v1 = vmul.f32 %v2691_v12, %v2067_v18  ;;  %2876 = vmatprep.mubr.msk.f32.mxu1 %vm801_vm2, %v2082_v23 }
 0xb72   : > { %v2083_v19 = vadd.f32 %v2692_v24, %v2075_v1 }
 0xb74   : > { %2877 = vmatmul.mubr.msk.f32.vlgmr.msra.gmra.mrb[10].mxu1 %vm801_vm2, %v2083_v19 }
 0xc47   : > { %v2878_v27 = vpop.f32.mrb[10].mxu1 }
 0xc48   : > { %v2173_v28 = vadd.f32 %v2878_v27, %v2693_v0  ;;  %v2167_v29 = vpop.f32.mrb[11].mxu1 }
 0xc49   : > { %v2168_v30 = vadd.f32 %v2693_v0, %v2167_v29 }
 0xc4a   : > { %v2177_v32 = vmax.f32 %v2173_v28, 0.0 }
 0xc4b   : > { %v2176_v31 = vmax.f32 %v2168_v30, 0.0 }
 0xc4d   : > { %2887 = vmatprep.mubr.msk.f32.mxu0 %vm801_vm2, %v2176_v31 }
 0xc4e   : > { %2888 = vmatmul.mubr.msk.f32.vlgmr.msra.gmra.mrb[10].mxu0 %vm801_vm2, %v2177_v32 }
 0xc4f   : > { %2976 = vmatpush3.bf16.msra.mxu0 (!%p2701_p5), %v2973_v3 }
 0xc50   : > { %2978 = vmatprep.subr.bf16.mxu0 (!%p2701_p5), %v2977_v5 }
 0xc53   : > { %2980 = vmatpush3.bf16.msra.mxu0 (!%p2701_p5), %v2977_v5 }
 0xd21   : > { %v2889_v22 = vpop.f32.mrb[10].mxu0 }
 0xd22   : > { %v2261_v33 = vpop.f32.mrb[11].mxu0  ;;  %v2267_v34 = vadd.f32 %v2889_v22, %v2696_v16 }
 0xd23   : > { %v2262_v35 = vadd.f32 %v2696_v16, %v2261_v33 }
 0xd24   : > { %v2271_v38 = vadd.f32 %v2267_v34, %v2083_v19 }
 0xd25   : > { %v2270_v36 = vadd.f32 %v2262_v35, %v2082_v23 }
 0xd26   : > { %v2277_v39 = vsel %vm2043_vm10, %v2271_v38, 0.0 }
 0xd27   : > { %v2274_v37 = vsel %vm801_vm2, %v2270_v36, 0.0 }
 0xd28   : > { %2275 = vadd.xlane.f32.xlu0 %v2274_v37 }
 0xd2c   : > { %2278 = vadd.xlane.f32.xlu0 %v2277_v39 }
 0xdb5   : > { %v2276_v41 = vpop.xlane.xlu0 %2275 }
 0xdb6   : > { %v2280_v40 = vmul.f32 0.03125, %v2276_v41 }
 0xdb8   : > { %v2282_v15 = vsub.f32 %v2270_v36, %v2280_v40 }
 0xdb9   : > { %v2279_v42 = vpop.xlane.xlu0 %2278 }
 0xdba   : > { %v2281_v43 = vmul.f32 0.03125, %v2279_v42  ;;  %v2284_v44 = vmul.f32 %v2282_v15, %v2282_v15 }
 0xdbc   : > { %v2283_v45 = vsub.f32 %v2271_v38, %v2281_v43  ;;  %v2286_v46 = vsel %vm801_vm2, %v2284_v44, 0.0 }
 0xdbd   : > { %2287 = vadd.xlane.f32.xlu0 %v2286_v46 }
 0xdbe   : > { %v2285_v20 = vmul.f32 %v2283_v45, %v2283_v45 }
 0xdc0   : > { %v2289_v47 = vsel %vm2043_vm10, %v2285_v20, 0.0 }
 0xdc1   : > { %2290 = vadd.xlane.f32.xlu0 %v2289_v47 }
 0xe4a   : > { %v2288_v48 = vpop.xlane.xlu0 %2287 }
 0xe4b   : > { %v2292_v49 = vmul.f32 0.03125, %v2288_v48 }
 0xe4d   : > { %v2294_v50 = vadd.f32 1e-06, %v2292_v49 }
 0xe4e   : > { %v2291_v51 = vpop.xlane.xlu0 %2290 }
 0xe4f   : > { %3161 = vrsqrt.f32 %v2294_v50  ;;  %v2293_v52 = vmul.f32 0.03125, %v2291_v51 }
 0xe51   : > { %v2295_v53 = vadd.f32 1e-06, %v2293_v52 }
 0xe53   : > { %3163 = vrsqrt.f32 %v2295_v53 }
 0xe59   : > { %v3162_v54 = vpop.eup %3161 }
 0xe5a   : > { %v2298_v9 = vmul.f32 %v3162_v54, %v2282_v15 }
 0xe5c   : > { %v2306_v56 = vmul.f32 %v2699_v7, %v2298_v9 }
 0xe5d   : > { %v3164_v57 = vpop.eup %3163 }
 0xe5e   : > { %v2314_v58 = vadd.f32 %v2700_v55, %v2306_v56  ;;  %v2299_v59 = vmul.f32 %v3164_v57, %v2283_v45  ;;  %2321 = sbr.rel (%p2701_p5) target bundleno = 3900 (0xf3c), region = 116 }
 0xe60   : > { %2316 = vst.msk [vmem:[#allocation2] sm:$0xff] %vm801_vm2, %v2314_v58  ;;  %v2307_v60 = vmul.f32 %v2699_v7, %v2299_v59  ;;  %2898 = vmatprep.mubr.msk.f32.mxu0 (!%p2701_p5), %vm801_vm2, %v2314_v58 }
 0xe62   : > { %v2315_v61 = vadd.f32 %v2700_v55, %v2307_v60 }
 0xe64   : > { %2317 = vst.msk [vmem:[#allocation2 + $0x8] sm:$0x3] %vm2043_vm10, %v2315_v61  ;;  %2899 = vmatmul.mubr.msk.f32.vlgmr.msra.gmra.mrb[0].mxu0 (!%p2701_p5), %vm801_vm2, %v2315_v61 }
 0xf37   : > { %v2900_v8 = vpop.f32.mrb[0].mxu0 }
 0xf38   : > { %v2411_v10 = vadd.f32 %v2900_v8, %v2702_v6  ;;  %v2405_v11 = vpop.f32.mrb[1].mxu0 }
 0xf39   : > { %v2406_v12 = vadd.f32 %v2702_v6, %v2405_v11 }
 0xf3a   : > { %2415 = vst [vmem:[#allocation12 + $0x8] sm:$0x3] %v2411_v10 }
 0xf3b   : > { %2414 = vst [vmem:[#allocation12] sm:$0xff] %v2406_v12 }
 0xf3c PF: > { %p3032_p1 = scmp.eq.s32.totalorder %s3542_s25, 1  ;;  %s3435_s20 = smov [#allocation12]  }
 0xf3d   : > { %s2422_s15 = sshll.u32 %s3435_s20, 4  ;;  %s2423_s15 = int_to_ptr.vmem [resolvable:$true] %s2422_s15 }
 0xf3e   : > { %s3341_s23 = scalar_lea.vmem %s2423_s15, 256  ;;  %p3348_p3 = scmp.lt.s32.totalorder %s2423_s15, %s2423_s15 }
 0xf3f   : > { %p3342_p8 = scmp.ne.s32.totalorder %s2423_s15, %s3341_s23  ;;  %p3349_p9 = scmp.lt.s32.totalorder %s3341_s23, %s3341_s23 }
 0xf41   : > { %p3343_p11 = pnand %p3342_p8, %p3032_p1  ;;  %p3350_p12 = por %p3349_p9, %p3348_p3 }
 0xf43   : > { %p3344_p10 = pneg %p3343_p11 }
 0xf45   : > { %p3351_p2 = pnand %p3350_p12, %p3344_p10 }
 0xf47   : > { %3354 = shalt.err (!%p3351_p2)
}
 0xf48   : > { %s4206_s6 = sld [smem:[#allocation32_spill]] }
 0xf4e   : > { %s3355_s29 = scalar_lea.hbm %s4206_s6, 256 }
 0xf4f   : > { %p3356_p6 = scmp.ne.s32.totalorder %s4206_s6, %s3355_s29  ;;  %p3361_p7 = scmp.lt.u32.totalorder %s3355_s29, %s4206_s6 }
 0xf51   : > { %p3357_p4 = pnand %p3356_p6, %p3032_p1 }
 0xf53   : > { %p3358_p0 = pneg %p3357_p4 }
 0xf55   : > { %p3363_p13 = pnand %p3361_p7, %p3358_p0 }
 0xf57   : > { %3366 = shalt.err (!%p3363_p13)
}
 0xf58   : > { %s3436_s17 = smov 128   ;;  %s3437_s27 = smov 8  }
 0xf59   : > { %3004 = dma.vmem_to_hbm [thread:$0]  (%p3032_p1), %s2423_s15, 256, %s4206_s6, [#allocation5], %s3436_s17, %s3436_s17, %s3437_s27  }
 0xf5a   : > { %3396 = dma.done.wait (%p3032_p1), [#allocation5], 256  }
 0xf5b   : > { %3398 = vsyncadd (%p3032_p1), [#allocation5], 4294967040 }
 0xf5c PF: > { %s4207_s24 = sld [smem:[#allocation18_spill]]  ;;  %s4208_s2 = sld [smem:[#allocation17_spill]] }
 0xf5d   : > { %s4209_s23 = sld [smem:[#allocation19_spill]]  ;;  %s4210_s21 = smov %s3405_s22 }
 0xf62   : > { %p26_p5 = scmp.ge.s32.totalorder %s4207_s24, 4   ;;  %s4211_s22 = smov %s4208_s2 }
 0xf64   :  { %28 = sbr.rel (!%p26_p5) target bundleno = 18 (0x12), region = 193 }
 0xf6b   :  { %2438 = vsyncpa [#allocation4], 1 }
 0xf6c   :  { %2440 = vsyncpa [#allocation4 + $0x1], 1 }
 0xf6d   :  { %2441 = vsyncpa [#allocation7], 1 }
 0xf6e   :  { %2442 = vsyncpa [#allocation5], 1 }
 0xf6f   :  { %2444 = vsyncpa [#allocation5 + $0x1], 1 }

</bundles_post_ra>
